<compile_context>
chip_gen: v5e
topology: v5e:2x2
jax: 0.10.0
libtpu: 0.0.40
codegen_flags: <defaults>
</compile_context>

<pallas_src>
import functools

import jax
import jax.numpy as jnp
import numpy as np
from jax import lax
from jax.experimental import pallas as pl
from jax.experimental.pallas import tpu as pltpu

EPS = 1e-5


# --------------------------------------------------------------------------- #
# Pallas kernels
# --------------------------------------------------------------------------- #
def _ds(start, size, stride):
    return pl.ds(start, size) if stride == 1 else pl.ds(start, size, stride=stride)


def _main_path(xp_ref, w1_ref, c1_ref, w2_ref, c2_ref, w3_ref, c3_ref,
               y1_scr, tho, wo, stride):
    """conv1+bn1+relu -> 3x3 stride-s conv+bn2+relu -> conv3+bn3.

    Returns the pre-shortcut, pre-ReLU activation, shape (tho*wo, Cout), f32.
    """
    s = stride
    hp, wp, cin = xp_ref.shape[1], xp_ref.shape[2], xp_ref.shape[3]
    cmid = w1_ref.shape[1]
    r_rows = y1_scr.shape[0]                       # (tho - 1) * s + 3

    t = pl.program_id(1)
    row_lo = pl.multiple_of(t * (tho * s), tho * s)

    # ---- conv1 (1x1) + folded BN + ReLU on the slab (tile rows + halo) ------
    x_slab = xp_ref[0, pl.ds(row_lo, r_rows), :, :]           # (R, Wp, Cin) bf16
    y1 = jnp.dot(x_slab.reshape(r_rows * wp, cin), w1_ref[...],
                 preferred_element_type=jnp.float32)
    y1 = jnp.maximum(y1 + c1_ref[...], 0.0).reshape(r_rows, wp, cmid)

    # xp is zero-padded, but relu(conv1(0)) = relu(c1) != 0; the 3x3 conv needs
    # exact zeros on the padding ring, so mask it before writing the scratch.
    grow = row_lo + lax.broadcasted_iota(jnp.int32, (r_rows, wp, cmid), 0)
    gcol = lax.broadcasted_iota(jnp.int32, (r_rows, wp, cmid), 1)
    ring = (grow < 1) | (grow > hp - 2) | (gcol < 1) | (gcol > wp - 2)
    y1_scr[...] = jnp.where(ring, 0.0, y1)

    # ---- conv2: 3x3 stride-s conv as 9 accumulated MXU matmuls --------------
    acc = jnp.zeros((tho * wo, cmid), jnp.float32)
    for ky in range(3):
        for kx in range(3):
            tap = y1_scr[_ds(ky, tho, s), _ds(kx, wo, s), :]   # (tho, wo, cmid)
            acc = acc + jnp.dot(
                tap.reshape(tho * wo, cmid).astype(jnp.bfloat16),
                w2_ref[ky * 3 + kx],
                preferred_element_type=jnp.float32)
    y2 = jnp.maximum(acc + c2_ref[...], 0.0).astype(jnp.bfloat16)

    # ---- conv3 (1x1) + folded BN --------------------------------------------
    y3 = jnp.dot(y2, w3_ref[...], preferred_element_type=jnp.float32)
    return y3 + c3_ref[...]


def _block_kernel_proj(xp_ref, res_ref, w1_ref, c1_ref, w2_ref, c2_ref,
                       w3_ref, c3_ref, ws_ref, cs_ref, o_ref, y1_scr, *,
                       stride):
    """Variant with a 1x1 stride-s conv + BN projection shortcut."""
    _, tho, wo, cout = o_ref.shape
    y3 = _main_path(xp_ref, w1_ref, c1_ref, w2_ref, c2_ref, w3_ref, c3_ref,
                    y1_scr, tho, wo, stride)
    res = res_ref[0].reshape(tho * wo, res_ref.shape[3])
    sc = jnp.dot(res, ws_ref[...], preferred_element_type=jnp.float32)
    sc = sc + cs_ref[...]
    o_ref[0] = jnp.maximum(y3 + sc, 0.0).reshape(tho, wo, cout).astype(o_ref.dtype)


def _block_kernel_identity(xp_ref, res_ref, w1_ref, c1_ref, w2_ref, c2_ref,
                           w3_ref, c3_ref, o_ref, y1_scr, *, stride):
    """Variant with an identity shortcut: plain add, no projection matmul."""
    _, tho, wo, cout = o_ref.shape
    y3 = _main_path(xp_ref, w1_ref, c1_ref, w2_ref, c2_ref, w3_ref, c3_ref,
                    y1_scr, tho, wo, stride)
    res = res_ref[0].astype(jnp.float32).reshape(tho * wo, cout)
    o_ref[0] = jnp.maximum(y3 + res, 0.0).reshape(tho, wo, cout).astype(o_ref.dtype)


# --------------------------------------------------------------------------- #
# pallas_call wrapper
# --------------------------------------------------------------------------- #
def _full_spec(shape):
    nd = len(shape)
    return pl.BlockSpec(shape, lambda n, t, _nd=nd: (0,) * _nd)


def _bottleneck_call(xp, res, weights, *, stride, row_tile, ho, wo, cout,
                     has_proj):
    n, hp, wp, cin = xp.shape
    cmid = weights["w1"].shape[1]
    slab_rows = (row_tile - 1) * stride + 3

    in_arrays = [xp, res, weights["w1"], weights["c1"], weights["w2"],
                 weights["c2"], weights["w3"], weights["c3"]]
    in_specs = [
        # full padded image; constant block index along the row-tile axis so it
        # stays VMEM-resident across the row tiles of one image.
        pl.BlockSpec((1, hp, wp, cin), lambda nn, tt: (nn, 0, 0, 0)),
        # shortcut input: one output row tile per grid step.
        pl.BlockSpec((1, row_tile, wo, res.shape[3]),
                     lambda nn, tt: (nn, tt, 0, 0)),
    ] + [_full_spec(a.shape) for a in in_arrays[2:]]

    if has_proj:
        kernel = functools.partial(_block_kernel_proj, stride=stride)
        in_arrays += [weights["ws"], weights["cs"]]
        in_specs += [_full_spec(weights["ws"].shape),
                     _full_spec(weights["cs"].shape)]
    else:
        kernel = functools.partial(_block_kernel_identity, stride=stride)

    return pl.pallas_call(
        kernel,
        out_shape=jax.ShapeDtypeStruct((n, ho, wo, cout), jnp.float32),
        grid=(n, ho // row_tile),
        in_specs=in_specs,
        out_specs=pl.BlockSpec((1, row_tile, wo, cout),
                               lambda nn, tt: (nn, tt, 0, 0)),
        scratch_shapes=[pltpu.VMEM((slab_rows, wp, cmid), jnp.float32)],
        compiler_params=pltpu.CompilerParams(
            dimension_semantics=("parallel", "parallel"),
            vmem_limit_bytes=32 * 1024 * 1024,
        ),
    )(*in_arrays)


# --------------------------------------------------------------------------- #
# Parameter setup / glue
# --------------------------------------------------------------------------- #
def _fold_bn(bn_params):
    gamma, beta, mean, var = bn_params
    sc = gamma / jnp.sqrt(var + EPS)
    sh = beta - mean * sc
    return sc, sh


def _pick_row_tile(ho, wo, target_positions=1024):
    """Largest divisor of ho with row_tile * wo <= target output positions."""
    best = 1
    for d in range(1, ho + 1):
        if ho % d == 0 and d * wo <= target_positions:
            best = d
    return best


def init_params(key, in_channels, out_channels):
    """Deterministic synthetic parameters, PyTorch tensor layouts (OIHW)."""
    cmid, cout = out_channels, 4 * out_channels
    keys = iter(jax.random.split(key, 32))

    def w(shape, scale=0.1):
        return scale * jax.random.normal(next(keys), shape, jnp.float32)

    def bn(c):
        gamma = 1.0 + 0.1 * jax.random.normal(next(keys), (c,), jnp.float32)
        beta = 0.1 * jax.random.normal(next(keys), (c,), jnp.float32)
        mean = 0.1 * jax.random.normal(next(keys), (c,), jnp.float32)
        var = jax.random.uniform(next(keys), (c,), jnp.float32, minval=0.5, maxval=1.5)
        return (gamma, beta, mean, var)

    return dict(
        w1=w((cmid, in_channels, 1, 1)), b1=w((cmid,)), bn1=bn(cmid),
        w2=w((cmid, cmid, 3, 3)),        b2=w((cmid,)), bn2=bn(cmid),
        w3=w((cout, cmid, 1, 1)),        b3=w((cout,)), bn3=bn(cout),
        ws=w((cout, in_channels, 1, 1)),                bns=bn(cout),
    )


def bottleneck_block(x_nchw, params, stride, row_tile=None):
    """Pallas implementation of BottleneckBlock.forward (eval-mode BN). NCHW in/out."""
    x = jnp.transpose(x_nchw, (0, 2, 3, 1)).astype(jnp.float32)     # -> NHWC
    n, h, w, cin = x.shape
    cmid = params["w1"].shape[0]
    cout = params["w3"].shape[0]
    s = stride
    ho = (h - 1) // s + 1
    wo = (w - 1) // s + 1

    # Fold eval-mode BN into the conv weights (scale) and shifts (bias).
    sc1, sh1 = _fold_bn(params["bn1"])
    sc2, sh2 = _fold_bn(params["bn2"])
    sc3, sh3 = _fold_bn(params["bn3"])

    weights = dict(
        w1=(params["w1"][:, :, 0, 0].T * sc1).astype(jnp.bfloat16),        # (Cin, Cmid)
        c1=(params["b1"] * sc1 + sh1).reshape(1, cmid).astype(jnp.float32),
        w2=(jnp.transpose(params["w2"], (2, 3, 1, 0)).reshape(9, cmid, cmid)
            * sc2).astype(jnp.bfloat16),                                   # (9, Cmid, Cmid)
        c2=(params["b2"] * sc2 + sh2).reshape(1, cmid).astype(jnp.float32),
        w3=(params["w3"][:, :, 0, 0].T * sc3).astype(jnp.bfloat16),        # (Cmid, Cout)
        c3=(params["b3"] * sc3 + sh3).reshape(1, cout).astype(jnp.float32),
    )

    # Zero-pad spatially (halo for the 3x3 conv). The conv1 contribution on the
    # padding ring is masked to exact zero inside the kernel.
    xp = jnp.pad(x, ((0, 0), (1, 1), (1, 1), (0, 0))).astype(jnp.bfloat16)

    has_proj = (s != 1) or (cin != cout)
    if has_proj:
        scs, shs = _fold_bn(params["bns"])
        weights["ws"] = (params["ws"][:, :, 0, 0].T * scs).astype(jnp.bfloat16)
        weights["cs"] = shs.reshape(1, cout).astype(jnp.float32)
        # TODO(synk): read the strided shortcut rows straight from the resident
        # padded-x tile inside the kernel instead of materializing this copy.
        res = x[:, ::s, ::s, :].astype(jnp.bfloat16)                  # (N, Ho, Wo, Cin)
    else:
        res = x                                                       # f32, Cin == Cout

    if row_tile is None:
        row_tile = _pick_row_tile(ho, wo)
    assert ho % row_tile == 0, (ho, row_tile)

    out = _bottleneck_call(xp, res, weights, stride=s, row_tile=row_tile,
                           ho=ho, wo=wo, cout=cout, has_proj=has_proj)
    return jnp.transpose(out, (0, 3, 1, 2))                           # -> NCHW


# --------------------------------------------------------------------------- #
# Pure-JAX reference (for validation)
# --------------------------------------------------------------------------- #
def reference_forward(x_nchw, params, stride):
    x = jnp.transpose(x_nchw, (0, 2, 3, 1)).astype(jnp.float32)

    def conv(x, w_oihw, strides, pad):
        w = jnp.transpose(w_oihw, (2, 3, 1, 0))                       # HWIO
        return lax.conv_general_dilated(
            x, w, strides, pad, dimension_numbers=("NHWC", "HWIO", "NHWC"))

    def bn(x, p):
        gamma, beta, mean, var = p
        return (x - mean) / jnp.sqrt(var + EPS) * gamma + beta

    y = jax.nn.relu(bn(conv(x, params["w1"], (1, 1), [(0, 0), (0, 0)])
                       + params["b1"], params["bn1"]))
    y = jax.nn.relu(bn(conv(y, params["w2"], (stride, stride), [(1, 1), (1, 1)])
                       + params["b2"], params["bn2"]))
    y = bn(conv(y, params["w3"], (1, 1), [(0, 0), (0, 0)])
           + params["b3"], params["bn3"])
    cin, cout = x.shape[-1], params["w3"].shape[0]
    if stride != 1 or cin != cout:
        r = bn(conv(x, params["ws"], (stride, stride), [(0, 0), (0, 0)]),
               params["bns"])
    else:
        r = x
    out = jax.nn.relu(y + r)
    return jnp.transpose(out, (0, 3, 1, 2))


# --------------------------------------------------------------------------- #
if __name__ == "__main__":
    key = jax.random.PRNGKey(0)
    kx, kp, kx2, kp2 = jax.random.split(key, 4)

    # --- projection shortcut path (stride 2, Cin != 4*out_channels) ----------
    n, cin, h, w = 2, 16, 16, 16
    out_channels, stride = 8, 2                                     # Cout = 32
    x = jax.random.normal(kx, (n, cin, h, w), jnp.float32)
    params = init_params(kp, cin, out_channels)

    y = bottleneck_block(x, params, stride, row_tile=4)             # 2 row tiles
    y = jax.block_until_ready(y)

    ho = (h - 1) // stride + 1
    assert y.shape == (n, 4 * out_channels, ho, ho), y.shape
    y_ref = reference_forward(x, params, stride)
    np.testing.assert_allclose(np.asarray(y), np.asarray(y_ref),
                               rtol=5e-2, atol=5e-2)

    # --- identity shortcut path (stride 1, Cin == 4*out_channels) ------------
    cin2, out_channels2, stride2 = 32, 8, 1
    x2 = jax.random.normal(kx2, (n, cin2, h, w), jnp.float32)
    params2 = init_params(kp2, cin2, out_channels2)

    y2 = bottleneck_block(x2, params2, stride2, row_tile=8)         # 2 row tiles
    y2 = jax.block_until_ready(y2)
    y2_ref = reference_forward(x2, params2, stride2)
    np.testing.assert_allclose(np.asarray(y2), np.asarray(y2_ref),
                               rtol=5e-2, atol=5e-2)

    print("KERNEL_OK")
</pallas_src>

<mosaic_0001>
module attributes {stable_mosaic.version = 11 : i64} {
  func.func @_block_kernel_proj(%arg0: i32, %arg1: i32, %arg2: memref<1x18x18x16xbf16, #tpu.memory_space<vmem>>, %arg3: memref<1x4x8x16xbf16, #tpu.memory_space<vmem>>, %arg4: memref<16x8xbf16, #tpu.memory_space<vmem>>, %arg5: memref<1x8xf32, #tpu.memory_space<vmem>>, %arg6: memref<9x8x8xbf16, #tpu.memory_space<vmem>>, %arg7: memref<1x8xf32, #tpu.memory_space<vmem>>, %arg8: memref<8x32xbf16, #tpu.memory_space<vmem>>, %arg9: memref<1x32xf32, #tpu.memory_space<vmem>>, %arg10: memref<16x32xbf16, #tpu.memory_space<vmem>>, %arg11: memref<1x32xf32, #tpu.memory_space<vmem>>, %arg12: memref<1x4x8x32xf32, #tpu.memory_space<vmem>>, %arg13: memref<9x18x8xf32, #tpu.memory_space<vmem>>) attributes {dimension_semantics = [#tpu.dimension_semantics<parallel>, #tpu.dimension_semantics<parallel>], iteration_bounds = array<i64: 2, 2>, scalar_prefetch = 0 : i64, scratch_operands = 1 : i64, tpu.core_type = #tpu.core_type<tc>, window_params = [{transform_indices = @transform_0, window_bounds = array<i64: 1, 18, 18, 16>}, {transform_indices = @transform_1, window_bounds = array<i64: 1, 4, 8, 16>}, {pipeline_mode = #tpu.pipeline_mode<synchronous>, transform_indices = @transform_2, window_bounds = array<i64: 16, 8>}, {pipeline_mode = #tpu.pipeline_mode<synchronous>, transform_indices = @transform_3, window_bounds = array<i64: 1, 8>}, {pipeline_mode = #tpu.pipeline_mode<synchronous>, transform_indices = @transform_4, window_bounds = array<i64: 9, 8, 8>}, {pipeline_mode = #tpu.pipeline_mode<synchronous>, transform_indices = @transform_5, window_bounds = array<i64: 1, 8>}, {pipeline_mode = #tpu.pipeline_mode<synchronous>, transform_indices = @transform_6, window_bounds = array<i64: 8, 32>}, {pipeline_mode = #tpu.pipeline_mode<synchronous>, transform_indices = @transform_7, window_bounds = array<i64: 1, 32>}, {pipeline_mode = #tpu.pipeline_mode<synchronous>, transform_indices = @transform_8, window_bounds = array<i64: 16, 32>}, {pipeline_mode = #tpu.pipeline_mode<synchronous>, transform_indices = @transform_9, window_bounds = array<i64: 1, 32>}, {transform_indices = @transform_10, window_bounds = array<i64: 1, 4, 8, 32>}]} {
    %c8_i32 = arith.constant 8 : i32
    %0 = arith.muli %arg1, %c8_i32 : i32
    %1 = tpu.assume_multiple %0, 8 : i32
    %c0 = arith.constant 0 : index
    %2 = arith.index_cast %1 : i32 to index
    %c0_0 = arith.constant 0 : index
    %c0_1 = arith.constant 0 : index
    %3 = vector.load %arg2[%c0, %2, %c0_0, %c0_1] : memref<1x18x18x16xbf16, #tpu.memory_space<vmem>>, vector<1x9x18x16xbf16>
    %4 = vector.shape_cast %3 : vector<1x9x18x16xbf16> to vector<9x18x16xbf16>
    %5 = vector.shape_cast %4 : vector<9x18x16xbf16> to vector<162x16xbf16>
    %c0_2 = arith.constant 0 : index
    %c0_3 = arith.constant 0 : index
    %6 = vector.load %arg4[%c0_2, %c0_3] : memref<16x8xbf16, #tpu.memory_space<vmem>>, vector<16x8xbf16>
    %cst = arith.constant dense<0.000000e+00> : vector<162x8xf32>
    %7 = tpu.matmul %5, %6, %cst {dimension_numbers = #tpu.dot_dimension_numbers<[1], [0], [0], [1], [0, 0, 1, 1], [], []>} : vector<162x16xbf16>, vector<16x8xbf16>, vector<162x8xf32> -> vector<162x8xf32>
    %c0_4 = arith.constant 0 : index
    %c0_5 = arith.constant 0 : index
    %8 = vector.load %arg5[%c0_4, %c0_5] : memref<1x8xf32, #tpu.memory_space<vmem>>, vector<1x8xf32>
    %9 = vector.broadcast %8 : vector<1x8xf32> to vector<162x8xf32>
    %10 = arith.addf %7, %9 : vector<162x8xf32>
    %cst_6 = arith.constant 0.000000e+00 : f32
    %11 = vector.broadcast %cst_6 : f32 to vector<162x8xf32>
    %12 = arith.maximumf %10, %11 : vector<162x8xf32>
    %13 = vector.shape_cast %12 : vector<162x8xf32> to vector<9x18x8xf32>
    %14 = tpu.iota {dimensions = array<i32: 0>} : vector<9x18x8xi32>
    %15 = vector.broadcast %1 : i32 to vector<9x18x8xi32>
    %16 = arith.addi %15, %14 : vector<9x18x8xi32>
    %17 = tpu.iota {dimensions = array<i32: 1>} : vector<9x18x8xi32>
    %c1_i32 = arith.constant 1 : i32
    %18 = vector.broadcast %c1_i32 : i32 to vector<9x18x8xi32>
    %19 = arith.cmpi slt, %16, %18 : vector<9x18x8xi32>
    %c16_i32 = arith.constant 16 : i32
    %20 = vector.broadcast %c16_i32 : i32 to vector<9x18x8xi32>
    %21 = arith.cmpi sgt, %16, %20 : vector<9x18x8xi32>
    %22 = arith.ori %19, %21 : vector<9x18x8xi1>
    %c1_i32_7 = arith.constant 1 : i32
    %23 = vector.broadcast %c1_i32_7 : i32 to vector<9x18x8xi32>
    %24 = arith.cmpi slt, %17, %23 : vector<9x18x8xi32>
    %25 = arith.ori %22, %24 : vector<9x18x8xi1>
    %c16_i32_8 = arith.constant 16 : i32
    %26 = vector.broadcast %c16_i32_8 : i32 to vector<9x18x8xi32>
    %27 = arith.cmpi sgt, %17, %26 : vector<9x18x8xi32>
    %28 = arith.ori %25, %27 : vector<9x18x8xi1>
    %cst_9 = arith.constant 0.000000e+00 : f32
    %29 = vector.broadcast %cst_9 : f32 to vector<9x18x8xf32>
    %30 = arith.select %28, %29, %13 : vector<9x18x8xi1>, vector<9x18x8xf32>
    %c0_10 = arith.constant 0 : index
    %c0_11 = arith.constant 0 : index
    %c0_12 = arith.constant 0 : index
    %31 = vector.load %arg13[%c0_10, %c0_11, %c0_12] : memref<9x18x8xf32, #tpu.memory_space<vmem>>, vector<9x18x8xf32>
    tpu.vector_store %arg13[%c0_10, %c0_11, %c0_12], %30 {strides = array<i32>} : memref<9x18x8xf32, #tpu.memory_space<vmem>>, vector<9x18x8xf32>,
    %cst_13 = arith.constant 0.000000e+00 : f32
    %32 = vector.broadcast %cst_13 : f32 to vector<32x8xf32>
    %c0_14 = arith.constant 0 : index
    %c0_15 = arith.constant 0 : index
    %c0_16 = arith.constant 0 : index
    %33 = tpu.strided_load %arg13[%c0_14, %c0_15, %c0_16] {strides = array<i32: 2, 2, 1>} : memref<9x18x8xf32, #tpu.memory_space<vmem>>, vector<4x8x8xf32>
    %34 = vector.shape_cast %33 : vector<4x8x8xf32> to vector<32x8xf32>
    %35 = arith.truncf %34 : vector<32x8xf32> to vector<32x8xbf16>
    %c0_17 = arith.constant 0 : index
    %c0_18 = arith.constant 0 : index
    %c0_19 = arith.constant 0 : index
    %36 = vector.load %arg6[%c0_17, %c0_18, %c0_19] : memref<9x8x8xbf16, #tpu.memory_space<vmem>>, vector<1x8x8xbf16>
    %37 = vector.shape_cast %36 : vector<1x8x8xbf16> to vector<8x8xbf16>
    %cst_20 = arith.constant dense<0.000000e+00> : vector<32x8xf32>
    %38 = tpu.matmul %35, %37, %cst_20 {dimension_numbers = #tpu.dot_dimension_numbers<[1], [0], [0], [1], [0, 0, 1, 1], [], []>} : vector<32x8xbf16>, vector<8x8xbf16>, vector<32x8xf32> -> vector<32x8xf32>
    %39 = arith.addf %32, %38 : vector<32x8xf32>
    %c0_21 = arith.constant 0 : index
    %c1 = arith.constant 1 : index
    %c0_22 = arith.constant 0 : index
    %40 = tpu.strided_load %arg13[%c0_21, %c1, %c0_22] {strides = array<i32: 2, 2, 1>} : memref<9x18x8xf32, #tpu.memory_space<vmem>>, vector<4x8x8xf32>
    %41 = vector.shape_cast %40 : vector<4x8x8xf32> to vector<32x8xf32>
    %42 = arith.truncf %41 : vector<32x8xf32> to vector<32x8xbf16>
    %c1_23 = arith.constant 1 : index
    %c0_24 = arith.constant 0 : index
    %c0_25 = arith.constant 0 : index
    %43 = vector.load %arg6[%c1_23, %c0_24, %c0_25] : memref<9x8x8xbf16, #tpu.memory_space<vmem>>, vector<1x8x8xbf16>
    %44 = vector.shape_cast %43 : vector<1x8x8xbf16> to vector<8x8xbf16>
    %cst_26 = arith.constant dense<0.000000e+00> : vector<32x8xf32>
    %45 = tpu.matmul %42, %44, %cst_26 {dimension_numbers = #tpu.dot_dimension_numbers<[1], [0], [0], [1], [0, 0, 1, 1], [], []>} : vector<32x8xbf16>, vector<8x8xbf16>, vector<32x8xf32> -> vector<32x8xf32>
    %46 = arith.addf %39, %45 : vector<32x8xf32>
    %c0_27 = arith.constant 0 : index
    %c2 = arith.constant 2 : index
    %c0_28 = arith.constant 0 : index
    %47 = tpu.strided_load %arg13[%c0_27, %c2, %c0_28] {strides = array<i32: 2, 2, 1>} : memref<9x18x8xf32, #tpu.memory_space<vmem>>, vector<4x8x8xf32>
    %48 = vector.shape_cast %47 : vector<4x8x8xf32> to vector<32x8xf32>
    %49 = arith.truncf %48 : vector<32x8xf32> to vector<32x8xbf16>
    %c2_29 = arith.constant 2 : index
    %c0_30 = arith.constant 0 : index
    %c0_31 = arith.constant 0 : index
    %50 = vector.load %arg6[%c2_29, %c0_30, %c0_31] : memref<9x8x8xbf16, #tpu.memory_space<vmem>>, vector<1x8x8xbf16>
    %51 = vector.shape_cast %50 : vector<1x8x8xbf16> to vector<8x8xbf16>
    %cst_32 = arith.constant dense<0.000000e+00> : vector<32x8xf32>
    %52 = tpu.matmul %49, %51, %cst_32 {dimension_numbers = #tpu.dot_dimension_numbers<[1], [0], [0], [1], [0, 0, 1, 1], [], []>} : vector<32x8xbf16>, vector<8x8xbf16>, vector<32x8xf32> -> vector<32x8xf32>
    %53 = arith.addf %46, %52 : vector<32x8xf32>
    %c1_33 = arith.constant 1 : index
    %c0_34 = arith.constant 0 : index
    %c0_35 = arith.constant 0 : index
    %54 = tpu.strided_load %arg13[%c1_33, %c0_34, %c0_35] {strides = array<i32: 2, 2, 1>} : memref<9x18x8xf32, #tpu.memory_space<vmem>>, vector<4x8x8xf32>
    %55 = vector.shape_cast %54 : vector<4x8x8xf32> to vector<32x8xf32>
    %56 = arith.truncf %55 : vector<32x8xf32> to vector<32x8xbf16>
    %c3 = arith.constant 3 : index
    %c0_36 = arith.constant 0 : index
    %c0_37 = arith.constant 0 : index
    %57 = vector.load %arg6[%c3, %c0_36, %c0_37] : memref<9x8x8xbf16, #tpu.memory_space<vmem>>, vector<1x8x8xbf16>
    %58 = vector.shape_cast %57 : vector<1x8x8xbf16> to vector<8x8xbf16>
    %cst_38 = arith.constant dense<0.000000e+00> : vector<32x8xf32>
    %59 = tpu.matmul %56, %58, %cst_38 {dimension_numbers = #tpu.dot_dimension_numbers<[1], [0], [0], [1], [0, 0, 1, 1], [], []>} : vector<32x8xbf16>, vector<8x8xbf16>, vector<32x8xf32> -> vector<32x8xf32>
    %60 = arith.addf %53, %59 : vector<32x8xf32>
    %c1_39 = arith.constant 1 : index
    %c1_40 = arith.constant 1 : index
    %c0_41 = arith.constant 0 : index
    %61 = tpu.strided_load %arg13[%c1_39, %c1_40, %c0_41] {strides = array<i32: 2, 2, 1>} : memref<9x18x8xf32, #tpu.memory_space<vmem>>, vector<4x8x8xf32>
    %62 = vector.shape_cast %61 : vector<4x8x8xf32> to vector<32x8xf32>
    %63 = arith.truncf %62 : vector<32x8xf32> to vector<32x8xbf16>
    %c4 = arith.constant 4 : index
    %c0_42 = arith.constant 0 : index
    %c0_43 = arith.constant 0 : index
    %64 = vector.load %arg6[%c4, %c0_42, %c0_43] : memref<9x8x8xbf16, #tpu.memory_space<vmem>>, vector<1x8x8xbf16>
    %65 = vector.shape_cast %64 : vector<1x8x8xbf16> to vector<8x8xbf16>
    %cst_44 = arith.constant dense<0.000000e+00> : vector<32x8xf32>
    %66 = tpu.matmul %63, %65, %cst_44 {dimension_numbers = #tpu.dot_dimension_numbers<[1], [0], [0], [1], [0, 0, 1, 1], [], []>} : vector<32x8xbf16>, vector<8x8xbf16>, vector<32x8xf32> -> vector<32x8xf32>
    %67 = arith.addf %60, %66 : vector<32x8xf32>
    %c1_45 = arith.constant 1 : index
    %c2_46 = arith.constant 2 : index
    %c0_47 = arith.constant 0 : index
    %68 = tpu.strided_load %arg13[%c1_45, %c2_46, %c0_47] {strides = array<i32: 2, 2, 1>} : memref<9x18x8xf32, #tpu.memory_space<vmem>>, vector<4x8x8xf32>
    %69 = vector.shape_cast %68 : vector<4x8x8xf32> to vector<32x8xf32>
    %70 = arith.truncf %69 : vector<32x8xf32> to vector<32x8xbf16>
    %c5 = arith.constant 5 : index
    %c0_48 = arith.constant 0 : index
    %c0_49 = arith.constant 0 : index
    %71 = vector.load %arg6[%c5, %c0_48, %c0_49] : memref<9x8x8xbf16, #tpu.memory_space<vmem>>, vector<1x8x8xbf16>
    %72 = vector.shape_cast %71 : vector<1x8x8xbf16> to vector<8x8xbf16>
    %cst_50 = arith.constant dense<0.000000e+00> : vector<32x8xf32>
    %73 = tpu.matmul %70, %72, %cst_50 {dimension_numbers = #tpu.dot_dimension_numbers<[1], [0], [0], [1], [0, 0, 1, 1], [], []>} : vector<32x8xbf16>, vector<8x8xbf16>, vector<32x8xf32> -> vector<32x8xf32>
    %74 = arith.addf %67, %73 : vector<32x8xf32>
    %c2_51 = arith.constant 2 : index
    %c0_52 = arith.constant 0 : index
    %c0_53 = arith.constant 0 : index
    %75 = tpu.strided_load %arg13[%c2_51, %c0_52, %c0_53] {strides = array<i32: 2, 2, 1>} : memref<9x18x8xf32, #tpu.memory_space<vmem>>, vector<4x8x8xf32>
    %76 = vector.shape_cast %75 : vector<4x8x8xf32> to vector<32x8xf32>
    %77 = arith.truncf %76 : vector<32x8xf32> to vector<32x8xbf16>
    %c6 = arith.constant 6 : index
    %c0_54 = arith.constant 0 : index
    %c0_55 = arith.constant 0 : index
    %78 = vector.load %arg6[%c6, %c0_54, %c0_55] : memref<9x8x8xbf16, #tpu.memory_space<vmem>>, vector<1x8x8xbf16>
    %79 = vector.shape_cast %78 : vector<1x8x8xbf16> to vector<8x8xbf16>
    %cst_56 = arith.constant dense<0.000000e+00> : vector<32x8xf32>
    %80 = tpu.matmul %77, %79, %cst_56 {dimension_numbers = #tpu.dot_dimension_numbers<[1], [0], [0], [1], [0, 0, 1, 1], [], []>} : vector<32x8xbf16>, vector<8x8xbf16>, vector<32x8xf32> -> vector<32x8xf32>
    %81 = arith.addf %74, %80 : vector<32x8xf32>
    %c2_57 = arith.constant 2 : index
    %c1_58 = arith.constant 1 : index
    %c0_59 = arith.constant 0 : index
    %82 = tpu.strided_load %arg13[%c2_57, %c1_58, %c0_59] {strides = array<i32: 2, 2, 1>} : memref<9x18x8xf32, #tpu.memory_space<vmem>>, vector<4x8x8xf32>
    %83 = vector.shape_cast %82 : vector<4x8x8xf32> to vector<32x8xf32>
    %84 = arith.truncf %83 : vector<32x8xf32> to vector<32x8xbf16>
    %c7 = arith.constant 7 : index
    %c0_60 = arith.constant 0 : index
    %c0_61 = arith.constant 0 : index
    %85 = vector.load %arg6[%c7, %c0_60, %c0_61] : memref<9x8x8xbf16, #tpu.memory_space<vmem>>, vector<1x8x8xbf16>
    %86 = vector.shape_cast %85 : vector<1x8x8xbf16> to vector<8x8xbf16>
    %cst_62 = arith.constant dense<0.000000e+00> : vector<32x8xf32>
    %87 = tpu.matmul %84, %86, %cst_62 {dimension_numbers = #tpu.dot_dimension_numbers<[1], [0], [0], [1], [0, 0, 1, 1], [], []>} : vector<32x8xbf16>, vector<8x8xbf16>, vector<32x8xf32> -> vector<32x8xf32>
    %88 = arith.addf %81, %87 : vector<32x8xf32>
    %c2_63 = arith.constant 2 : index
    %c2_64 = arith.constant 2 : index
    %c0_65 = arith.constant 0 : index
    %89 = tpu.strided_load %arg13[%c2_63, %c2_64, %c0_65] {strides = array<i32: 2, 2, 1>} : memref<9x18x8xf32, #tpu.memory_space<vmem>>, vector<4x8x8xf32>
    %90 = vector.shape_cast %89 : vector<4x8x8xf32> to vector<32x8xf32>
    %91 = arith.truncf %90 : vector<32x8xf32> to vector<32x8xbf16>
    %c8 = arith.constant 8 : index
    %c0_66 = arith.constant 0 : index
    %c0_67 = arith.constant 0 : index
    %92 = vector.load %arg6[%c8, %c0_66, %c0_67] : memref<9x8x8xbf16, #tpu.memory_space<vmem>>, vector<1x8x8xbf16>
    %93 = vector.shape_cast %92 : vector<1x8x8xbf16> to vector<8x8xbf16>
    %cst_68 = arith.constant dense<0.000000e+00> : vector<32x8xf32>
    %94 = tpu.matmul %91, %93, %cst_68 {dimension_numbers = #tpu.dot_dimension_numbers<[1], [0], [0], [1], [0, 0, 1, 1], [], []>} : vector<32x8xbf16>, vector<8x8xbf16>, vector<32x8xf32> -> vector<32x8xf32>
    %95 = arith.addf %88, %94 : vector<32x8xf32>
    %c0_69 = arith.constant 0 : index
    %c0_70 = arith.constant 0 : index
    %96 = vector.load %arg7[%c0_69, %c0_70] : memref<1x8xf32, #tpu.memory_space<vmem>>, vector<1x8xf32>
    %97 = vector.broadcast %96 : vector<1x8xf32> to vector<32x8xf32>
    %98 = arith.addf %95, %97 : vector<32x8xf32>
    %cst_71 = arith.constant 0.000000e+00 : f32
    %99 = vector.broadcast %cst_71 : f32 to vector<32x8xf32>
    %100 = arith.maximumf %98, %99 : vector<32x8xf32>
    %101 = arith.truncf %100 : vector<32x8xf32> to vector<32x8xbf16>
    %c0_72 = arith.constant 0 : index
    %c0_73 = arith.constant 0 : index
    %102 = vector.load %arg8[%c0_72, %c0_73] : memref<8x32xbf16, #tpu.memory_space<vmem>>, vector<8x32xbf16>
    %cst_74 = arith.constant dense<0.000000e+00> : vector<32x32xf32>
    %103 = tpu.matmul %101, %102, %cst_74 {dimension_numbers = #tpu.dot_dimension_numbers<[1], [0], [0], [1], [0, 0, 1, 1], [], []>} : vector<32x8xbf16>, vector<8x32xbf16>, vector<32x32xf32> -> vector<32x32xf32>
    %c0_75 = arith.constant 0 : index
    %c0_76 = arith.constant 0 : index
    %104 = vector.load %arg9[%c0_75, %c0_76] : memref<1x32xf32, #tpu.memory_space<vmem>>, vector<1x32xf32>
    %105 = vector.broadcast %104 : vector<1x32xf32> to vector<32x32xf32>
    %106 = arith.addf %103, %105 : vector<32x32xf32>
    %c0_77 = arith.constant 0 : index
    %c0_78 = arith.constant 0 : index
    %c0_79 = arith.constant 0 : index
    %c0_80 = arith.constant 0 : index
    %107 = vector.load %arg3[%c0_77, %c0_78, %c0_79, %c0_80] : memref<1x4x8x16xbf16, #tpu.memory_space<vmem>>, vector<1x4x8x16xbf16>
    %108 = vector.shape_cast %107 : vector<1x4x8x16xbf16> to vector<4x8x16xbf16>
    %109 = vector.shape_cast %108 : vector<4x8x16xbf16> to vector<32x16xbf16>
    %c0_81 = arith.constant 0 : index
    %c0_82 = arith.constant 0 : index
    %110 = vector.load %arg10[%c0_81, %c0_82] : memref<16x32xbf16, #tpu.memory_space<vmem>>, vector<16x32xbf16>
    %cst_83 = arith.constant dense<0.000000e+00> : vector<32x32xf32>
    %111 = tpu.matmul %109, %110, %cst_83 {dimension_numbers = #tpu.dot_dimension_numbers<[1], [0], [0], [1], [0, 0, 1, 1], [], []>} : vector<32x16xbf16>, vector<16x32xbf16>, vector<32x32xf32> -> vector<32x32xf32>
    %c0_84 = arith.constant 0 : index
    %c0_85 = arith.constant 0 : index
    %112 = vector.load %arg11[%c0_84, %c0_85] : memref<1x32xf32, #tpu.memory_space<vmem>>, vector<1x32xf32>
    %113 = vector.broadcast %112 : vector<1x32xf32> to vector<32x32xf32>
    %114 = arith.addf %111, %113 : vector<32x32xf32>
    %115 = arith.addf %106, %114 : vector<32x32xf32>
    %cst_86 = arith.constant 0.000000e+00 : f32
    %116 = vector.broadcast %cst_86 : f32 to vector<32x32xf32>
    %117 = arith.maximumf %115, %116 : vector<32x32xf32>
    %118 = vector.shape_cast %117 : vector<32x32xf32> to vector<4x8x32xf32>
    %c0_87 = arith.constant 0 : index
    %c0_88 = arith.constant 0 : index
    %c0_89 = arith.constant 0 : index
    %c0_90 = arith.constant 0 : index
    %119 = vector.load %arg12[%c0_87, %c0_88, %c0_89, %c0_90] : memref<1x4x8x32xf32, #tpu.memory_space<vmem>>, vector<1x4x8x32xf32>
    %120 = vector.shape_cast %119 : vector<1x4x8x32xf32> to vector<4x8x32xf32>
    %121 = vector.shape_cast %118 : vector<4x8x32xf32> to vector<1x4x8x32xf32>
    tpu.vector_store %arg12[%c0_87, %c0_88, %c0_89, %c0_90], %121 {strides = array<i32>} : memref<1x4x8x32xf32, #tpu.memory_space<vmem>>, vector<1x4x8x32xf32>,
    return
  }
  func.func @transform_0(%arg0: i32, %arg1: i32) -> (i32, i32, i32, i32) {
    %c0_i32 = arith.constant 0 : i32
    %c0_i32_0 = arith.constant 0 : i32
    %c0_i32_1 = arith.constant 0 : i32
    %c0_i32_2 = arith.constant 0 : i32
    return %arg0, %c0_i32, %c0_i32_0, %c0_i32_1 : i32, i32, i32, i32
  }
  func.func @transform_1(%arg0: i32, %arg1: i32) -> (i32, i32, i32, i32) {
    %c0_i32 = arith.constant 0 : i32
    %c0_i32_0 = arith.constant 0 : i32
    %c0_i32_1 = arith.constant 0 : i32
    return %arg0, %arg1, %c0_i32, %c0_i32_0 : i32, i32, i32, i32
  }
  func.func @transform_2(%arg0: i32, %arg1: i32) -> (i32, i32) {
    %c0_i32 = arith.constant 0 : i32
    %c0_i32_0 = arith.constant 0 : i32
    %c0_i32_1 = arith.constant 0 : i32
    return %c0_i32, %c0_i32_0 : i32, i32
  }
  func.func @transform_3(%arg0: i32, %arg1: i32) -> (i32, i32) {
    %c0_i32 = arith.constant 0 : i32
    %c0_i32_0 = arith.constant 0 : i32
    %c0_i32_1 = arith.constant 0 : i32
    return %c0_i32, %c0_i32_0 : i32, i32
  }
  func.func @transform_4(%arg0: i32, %arg1: i32) -> (i32, i32, i32) {
    %c0_i32 = arith.constant 0 : i32
    %c0_i32_0 = arith.constant 0 : i32
    %c0_i32_1 = arith.constant 0 : i32
    %c0_i32_2 = arith.constant 0 : i32
    return %c0_i32, %c0_i32_0, %c0_i32_1 : i32, i32, i32
  }
  func.func @transform_5(%arg0: i32, %arg1: i32) -> (i32, i32) {
    %c0_i32 = arith.constant 0 : i32
    %c0_i32_0 = arith.constant 0 : i32
    %c0_i32_1 = arith.constant 0 : i32
    return %c0_i32, %c0_i32_0 : i32, i32
  }
  func.func @transform_6(%arg0: i32, %arg1: i32) -> (i32, i32) {
    %c0_i32 = arith.constant 0 : i32
    %c0_i32_0 = arith.constant 0 : i32
    %c0_i32_1 = arith.constant 0 : i32
    return %c0_i32, %c0_i32_0 : i32, i32
  }
  func.func @transform_7(%arg0: i32, %arg1: i32) -> (i32, i32) {
    %c0_i32 = arith.constant 0 : i32
    %c0_i32_0 = arith.constant 0 : i32
    %c0_i32_1 = arith.constant 0 : i32
    return %c0_i32, %c0_i32_0 : i32, i32
  }
  func.func @transform_8(%arg0: i32, %arg1: i32) -> (i32, i32) {
    %c0_i32 = arith.constant 0 : i32
    %c0_i32_0 = arith.constant 0 : i32
    %c0_i32_1 = arith.constant 0 : i32
    return %c0_i32, %c0_i32_0 : i32, i32
  }
  func.func @transform_9(%arg0: i32, %arg1: i32) -> (i32, i32) {
    %c0_i32 = arith.constant 0 : i32
    %c0_i32_0 = arith.constant 0 : i32
    %c0_i32_1 = arith.constant 0 : i32
    return %c0_i32, %c0_i32_0 : i32, i32
  }
  func.func @transform_10(%arg0: i32, %arg1: i32) -> (i32, i32, i32, i32) {
    %c0_i32 = arith.constant 0 : i32
    %c0_i32_0 = arith.constant 0 : i32
    %c0_i32_1 = arith.constant 0 : i32
    return %arg0, %arg1, %c0_i32, %c0_i32_0 : i32, i32, i32, i32
  }
}

</mosaic_0001>

<bundles_post_ra>
// kernel: tpu_custom_call.1
= control target key start
LH: loop header
LB: loop body
LE: loop exit
PB: predicated region body
PF: predicated region fallthrough
CT: control target
= control target key end

     0   :  { %s2910_s0 = inlined_call_operand.vmem [shape: bf16[2,18,18,16], index: 0, kind: input, shape index: {}]   ;;  %s2911_s1 = inlined_call_operand.vmem [shape: bf16[2,8,8,16], index: 1, kind: input, shape index: {}]   ;;  %s2912_s2 = inlined_call_operand.vmem [shape: bf16[16,8], index: 2, kind: input, shape index: {}]   ;;  %s2913_s3 = inlined_call_operand.vmem [shape: f32[1,8], index: 3, kind: input, shape index: {}]   ;;  %s2914_s4 = inlined_call_operand.vmem [shape: bf16[9,8,8], index: 4, kind: input, shape index: {}]   ;;  %s2915_s5 = inlined_call_operand.vmem [shape: f32[1,8], index: 5, kind: input, shape index: {}]   ;;  %s2916_s6 = inlined_call_operand.vmem [shape: bf16[8,32], index: 6, kind: input, shape index: {}]   ;;  %s2917_s7 = inlined_call_operand.vmem [shape: f32[1,32], index: 7, kind: input, shape index: {}]   ;;  %s2918_s8 = inlined_call_operand.vmem [shape: bf16[16,32], index: 8, kind: input, shape index: {}]   ;;  %s2919_s9 = inlined_call_operand.vmem [shape: f32[1,32], index: 9, kind: input, shape index: {}]   ;;  %s2920_s10 = inlined_call_operand.hbm [shape: f32[2,8,8,32], index: 10, kind: output, shape index: {}]  }
   0x1   :  { %2923 = sst [smem:[#allocation8_spill]] %s2910_s0 }
   0x2   :  { %15 = vsyncpa [#allocation4], 0 }
   0x3   :  { %17 = vsyncpa [#allocation4 + $0x1], 0  ;;  %s2340_s13 = smov 0   ;;  %s2342_s14 = smov 0  }
   0x4   :  { %s2344_s15 = smov 0   ;;  %s2346_s16 = smov 0  }
   0x5   :  { %s2348_s17 = smov 0   ;;  %s2350_s18 = smov 0  }
   0x6   :  { %s2352_s19 = smov 0   ;;  %s2354_s20 = smov 0  }
   0x7 LB: > { %s2027_s21 = sadd.s32 4294967295, %s2281_s20   ;;  %s2028_s22 = sadd.s32 4294967294, %s2281_s20   ;;  %s2281_s20 = sphi %s2354_s20, %s23_s20   ;;  %s2277_s19 = sphi %s2352_s19, %s2965_s19   ;;  %s2273_s18 = sphi %s2350_s18, %s2964_s18   ;;  %s2269_s17 = sphi %s2348_s17, %s2963_s17   ;;  %s2265_s16 = sphi %s2346_s16, %s2962_s16   ;;  %s2261_s15 = sphi %s2344_s15, %s2961_s15   ;;  %s2257_s14 = sphi %s2342_s14, %s2960_s14   ;;  %s2253_s13 = sphi %s2340_s13, %s2959_s13  }
   0x8   : > { %s32_s23 = sadd.s32 1, %s2273_s18  ;;  %s35_s24 = sadd.s32 1, %s2277_s19 }
   0x9   : > { %p33_p0 = scmp.ge.s32.totalorder %s32_s23, 2  ;;  %p276_p1 = scmp.ne.s32.totalorder %s2261_s15, %s2257_s14 }
   0xa   : > { %p277_p2 = scmp.eq.s32.totalorder %s2027_s21, 3  ;;  %p282_p5 = scmp.ne.s32.totalorder %s2257_s14, %s2253_s13 }
   0xb   : > { %s2967_s23 = smov (%p33_p0, %s32_s23), 0  ;;  %s2969_s24 = smov (!%p33_p0, %s35_s24), %s2277_s19 }
   0xc   : > { %2924 = sst [smem:[#allocation6_spill]] %s2967_s23  ;;  %s262_s25 = ssub.s32 %s2273_s18, %s2967_s23 }
   0xd   : > { %p2391_p3 = por %p277_p2, %p276_p1  ;;  %p37_p4 = scmp.ge.s32.totalorder %s2969_s24, 2 }
   0xe   : > { %p283_p6 = scmp.eq.s32.totalorder %s2028_s22, 3  ;;  %p2031_p7 = scmp.ge.s32.totalorder %s2281_s20, 1 }
   0xf   : > { %s2971_s24 = smov (%p37_p4, %s2969_s24), 0  ;;  %p346_p9 = scmp.lt.s32.totalorder %s2281_s20, 5 }
  0x10   : > { %2926 = sst [smem:[#allocation7_spill]] %s2971_s24  ;;  %p2400_p8 = por %p283_p6, %p282_p5 }
  0x11   : > { %s261_s28 = ssub.s32 %s2277_s19, %s2971_s24  ;;  %s266_s29 = sadd.s32 1, %s2261_s15 }
  0x12   : > { %s263_s30 = sor.u32 %s262_s25, %s261_s28  ;;  %p347_p10 = pnand %p2031_p7, %p346_p9 }
  0x13   : > { %p264_p11 = scmp.eq.s32.totalorder %s263_s30, 0  ;;  %p393_p12 = scmp.lt.s32.totalorder (!%p347_p10), %s2269_s17, 1 }
  0x14   : > { %350 = sbr.rel (%p347_p10) target bundleno = 681 (0x2a9), region = 60  ;;  %s2928_s0 = sld [smem:[#allocation8_spill]] (!%p347_p10) }
  0x15   : > { %s2409_s11 = scalar_select %p264_p11, %s2261_s15, %s266_s29  }
  0x16   : > { %s2103_s24 = smul.u32 (!%p347_p10), 96, %s2265_s16  ;;  %s2836_s12 = sshll.u32 (!%p347_p10), %s2265_s16, 2 }
  0x17   : > { %p401_p13 = scmp.lt.s32.totalorder (!%p347_p10), %s2836_s12, 7  ;;  %s390_s30 = sand.u32 (!%p347_p10), 1, %s2257_s14  }
  0x19   : > { %v2104_v0 = vld [vmem:[%s2912_s2] sm:$0xff]  ;;  %s2416_s22 = scalar_select %p393_p12, %s2269_s17, 1  ;;  %vm495_vm0 = vcmask 1040384   ;;  %vm499_vm1 = vcmask 1041409   ;;  %vm503_vm2 = vcmask 1042434   ;;  %vm507_vm3 = vcmask 1043459  }
  0x1a   : > { %937 = vmatpush.bf16.msra.mxu0 %v2104_v0  ;;  %2108 = vmatpush.bf16.msra.mxu3 %v2104_v0  ;;  %vm907_vm4 = vcmask 130048   ;;  %vm1364_vm10 = vcmask 64512  }
  0x1b   : > { %s2109_s25 = smul.u32 216, %s2416_s22  ;;  %s2035_s21 = sshll.u32 %s2416_s22, 3 }
  0x1c   : > { %s2099_s22 = sshll.u32 %s2269_s17, 3 }
  0x1d   : > { %s397_s29 = scalar_lea.vmem %s2928_s0, %s2109_s25 }
  0x1e   : > { %s2423_s23 = scalar_lea.vmem %s397_s29, %s2103_s24  ;;  %s2032_s29 = sshll.u32 %s390_s30, 5 }
  0x1f   : > { %v414_v1 = vld [vmem:[%s2423_s23] sm:$0xf]  ;;  %v415_v2 = vld [vmem:[%s2423_s23 + $0x4] sm:$0xf]  ;;  %v417_v19 = vld [vmem:[%s2423_s23 + $0xc] sm:$0xf]  ;;  %s1903_s24 = sadd.s32 %s2099_s22, %s2836_s12 }
  0x20   : > { %v468_v3 = vrot.slane %v414_v1, 3  ;;  %v469_v4 = vrot.slane %v415_v2, 3  ;;  %v416_v20 = vld [vmem:[%s2423_s23 + $0x8] sm:$0x1]  ;;  %v471_v21 = vrot.slane %v417_v19, 3 }
  0x21   : > { %v418_v22 = vld [vmem:[%s2423_s23 + $0x10] sm:$0xf]  ;;  %v470_v23 = vrot.slane %v416_v20, 3  ;;  %v420_v39 = vld [vmem:[%s2423_s23 + $0x18] sm:$0xf] }
  0x22   : > { %v498_v5 = vsel %vm495_vm0, %v414_v1, %v468_v3  ;;  %v500_v6 = vsel %vm499_vm1, %v414_v1, %v468_v3  ;;  %v504_v7 = vsel %vm503_vm2, %v414_v1, %v468_v3  ;;  %v508_v8 = vsel %vm507_vm3, %v414_v1, %v468_v3  ;;  %v419_v40 = vld [vmem:[%s2423_s23 + $0x14] sm:$0x1]  ;;  %v421_v42 = vld [vmem:[%s2423_s23 + $0x1c] sm:$0xf]  ;;  %v423_v59 = vld [vmem:[%s2423_s23 + $0x24] sm:$0xf] }
  0x23   : > { %v502_v9 = vrot.slane %v500_v6, 1  ;;  %v506_v10 = vrot.slane %v504_v7, 2  ;;  %v510_v11 = vrot.slane %v508_v8, 3  ;;  %v513_v12 = vsel %vm495_vm0, %v415_v2, %v469_v4  ;;  %748 = vst [vmem:[#allocation1] ss:$9 sm:$0xff] %v498_v5 }
  0x24   : > { %v514_v13 = vsel %vm499_vm1, %v415_v2, %v469_v4  ;;  %v517_v14 = vsel %vm503_vm2, %v415_v2, %v469_v4  ;;  %v520_v15 = vsel %vm507_vm3, %v415_v2, %v469_v4  ;;  %759 = vst [vmem:[#allocation1 + $0x4] ss:$9 sm:$0xff] %v513_v12  ;;  %v472_v24 = vrot.slane %v418_v22, 3  ;;  %v422_v60 = vld [vmem:[%s2423_s23 + $0x20] sm:$0x1] }
  0x25   : > { %v516_v16 = vrot.slane %v514_v13, 1  ;;  %v519_v17 = vrot.slane %v517_v14, 2  ;;  %751 = vst [vmem:[#allocation1 + $0x1] ss:$9 sm:$0xff] %v502_v9  ;;  %v522_v18 = vrot.slane %v520_v15, 3  ;;  %v529_v25 = vsel %vm499_vm1, %v417_v19, %v471_v21 }
  0x26   : > { %754 = vst [vmem:[#allocation1 + $0x2] ss:$9 sm:$0xff] %v506_v10  ;;  %v532_v26 = vsel %vm503_vm2, %v417_v19, %v471_v21  ;;  %v525_v27 = vsel %vm495_vm0, %v416_v20, %v470_v23  ;;  %v535_v28 = vsel %vm507_vm3, %v417_v19, %v471_v21  ;;  %v528_v29 = vsel %vm495_vm0, %v417_v19, %v471_v21  ;;  %v424_v2 = vld [vmem:[%s2423_s23 + $0x28] sm:$0xf]  ;;  %v426_v15 = vld [vmem:[%s2423_s23 + $0x30] sm:$0xf] }
  0x27   : > { %757 = vst [vmem:[#allocation1 + $0x3] ss:$9 sm:$0xff] %v510_v11  ;;  %v531_v30 = vrot.slane %v529_v25, 1  ;;  %v534_v32 = vrot.slane %v532_v26, 2  ;;  %v541_v33 = vsel %vm499_vm1, %v418_v22, %v472_v24  ;;  %v537_v34 = vrot.slane %v535_v28, 3 }
  0x28   : > { %762 = vst [vmem:[#allocation1 + $0x5] ss:$9 sm:$0xff] %v516_v16  ;;  %v544_v35 = vsel %vm503_vm2, %v418_v22, %v472_v24  ;;  %v540_v36 = vsel %vm495_vm0, %v418_v22, %v472_v24  ;;  %v543_v37 = vrot.slane %v541_v33, 1  ;;  %v474_v41 = vrot.slane %v420_v39, 3  ;;  %v425_v16 = vld [vmem:[%s2423_s23 + $0x2c] sm:$0x1] }
  0x29   : > { %765 = vst [vmem:[#allocation1 + $0x6] ss:$9 sm:$0xff] %v519_v17  ;;  %v546_v38 = vrot.slane %v544_v35, 2  ;;  %v547_v43 = vsel %vm507_vm3, %v418_v22, %v472_v24  ;;  %v473_v44 = vrot.slane %v419_v40, 3  ;;  %v475_v45 = vrot.slane %v421_v42, 3 }
  0x2a   : > { %768 = vst [vmem:[#allocation1 + $0x7] ss:$9 sm:$0xff] %v522_v18  ;;  %v549_v46 = vrot.slane %v547_v43, 3  ;;  %v556_v47 = vsel %vm499_vm1, %v420_v39, %v474_v41  ;;  %v559_v48 = vsel %vm503_vm2, %v420_v39, %v474_v41  ;;  %v562_v50 = vsel %vm507_vm3, %v420_v39, %v474_v41  ;;  %v427_v33 = vld [vmem:[%s2423_s23 + $0x34] sm:$0xf] }
  0x2b   : > { %v552_v49 = vsel %vm495_vm0, %v419_v40, %v473_v44  ;;  %v555_v52 = vsel %vm495_vm0, %v420_v39, %v474_v41  ;;  %v558_v53 = vrot.slane %v556_v47, 1  ;;  %v561_v54 = vrot.slane %v559_v48, 2 }
  0x2c   : > { %v568_v55 = vsel %vm499_vm1, %v421_v42, %v475_v45  ;;  %v564_v56 = vrot.slane %v562_v50, 3  ;;  %v567_v57 = vsel %vm495_vm0, %v421_v42, %v475_v45  ;;  %v477_v61 = vrot.slane %v423_v59, 3 }
  0x2d   : > { %v570_v58 = vrot.slane %v568_v55, 1  ;;  %v571_v62 = vsel %vm503_vm2, %v421_v42, %v475_v45  ;;  %v574_v63 = vsel %vm507_vm3, %v421_v42, %v475_v45  ;;  %v476_v0 = vrot.slane %v422_v60, 3 }
  0x2e   : > { %v573_v1 = vrot.slane %v571_v62, 2  ;;  %v576_v3 = vrot.slane %v574_v63, 3  ;;  %v583_v4 = vsel %vm499_vm1, %v423_v59, %v477_v61  ;;  %v586_v5 = vsel %vm503_vm2, %v423_v59, %v477_v61 }
  0x2f   : > { %v579_v7 = vsel %vm495_vm0, %v422_v60, %v476_v0  ;;  %v589_v8 = vsel %vm507_vm3, %v423_v59, %v477_v61  ;;  %v478_v9 = vrot.slane %v424_v2, 3  ;;  %v582_v10 = vsel %vm495_vm0, %v423_v59, %v477_v61 }
  0x30   : > { %v585_v11 = vrot.slane %v583_v4, 1  ;;  %v588_v12 = vrot.slane %v586_v5, 2  ;;  %v591_v13 = vrot.slane %v589_v8, 3  ;;  %v480_v18 = vrot.slane %v426_v15, 3 }
  0x31   : > { %v769_v31 = vld [vmem:[#allocation1] sm:$0xff]  ;;  %v594_v14 = vsel %vm495_vm0, %v424_v2, %v478_v9  ;;  %v595_v17 = vsel %vm499_vm1, %v424_v2, %v478_v9  ;;  %v598_v19 = vsel %vm503_vm2, %v424_v2, %v478_v9  ;;  %v601_v20 = vsel %vm507_vm3, %v424_v2, %v478_v9 }
  0x32   : > { %2044 = vmatmul.msk.bf16.vlgmr.msra.gmra.mxu0 %vm907_vm4, %v769_v31  ;;  %770 = vst [vmem:[#allocation1] ss:$9 sm:$0xff] %v525_v27  ;;  %v479_v21 = vrot.slane %v425_v16, 3  ;;  %v597_v22 = vrot.slane %v595_v17, 1  ;;  %v600_v23 = vrot.slane %v598_v19, 2  ;;  %v603_v24 = vrot.slane %v601_v20, 3 }
  0x33   : > { %771 = vst [vmem:[#allocation1 + $0x1] ss:$9 sm:$0xff] %v528_v29  ;;  %v610_v25 = vsel %vm499_vm1, %v426_v15, %v480_v18  ;;  %v613_v27 = vsel %vm503_vm2, %v426_v15, %v480_v18  ;;  %v616_v29 = vsel %vm507_vm3, %v426_v15, %v480_v18  ;;  %v481_v35 = vrot.slane %v427_v33, 3  ;;  %v435_v17 = vld [vmem:[%s2423_s23 + $0x54] sm:$0xf] }
  0x34   : > { %773 = vst [vmem:[#allocation1 + $0x2] ss:$9 sm:$0xff] %v531_v30  ;;  %v606_v28 = vsel %vm495_vm0, %v425_v16, %v479_v21  ;;  %v609_v30 = vsel %vm495_vm0, %v426_v15, %v480_v18  ;;  %v612_v31 = vrot.slane %v610_v25, 1  ;;  %v489_v25 = vrot.slane %v435_v17, 3 }
  0x35   : > { %775 = vst [vmem:[#allocation1 + $0x3] ss:$9 sm:$0xff] %v534_v32  ;;  %v615_v32 = vrot.slane %v613_v27, 2  ;;  %v625_v40 = vsel %vm503_vm2, %v427_v33, %v481_v35  ;;  %v628_v41 = vsel %vm507_vm3, %v427_v33, %v481_v35  ;;  %v621_v43 = vsel %vm495_vm0, %v427_v33, %v481_v35 }
  0x36   : > { %777 = vst [vmem:[#allocation1 + $0x4] ss:$9 sm:$0xff] %v537_v34  ;;  %v618_v34 = vrot.slane %v616_v29, 3  ;;  %v627_v45 = vrot.slane %v625_v40, 2  ;;  %v630_v47 = vrot.slane %v628_v41, 3  ;;  %v690_v29 = vsel %vm495_vm0, %v435_v17, %v489_v25 }
  0x37   : > { %778 = vst [vmem:[#allocation1 + $0x5] ss:$9 sm:$0xff] %v540_v36  ;;  %v429_v36 = vld [vmem:[%s2423_s23 + $0x3c] sm:$0xf] }
  0x38   : > { %780 = vst [vmem:[#allocation1 + $0x6] ss:$9 sm:$0xff] %v543_v37  ;;  %v428_v37 = vld [vmem:[%s2423_s23 + $0x38] sm:$0x1]  ;;  %v483_v39 = vrot.slane %v429_v36, 3 }
  0x39   : > { %782 = vst [vmem:[#allocation1 + $0x7] ss:$9 sm:$0xff] %v546_v38  ;;  %v622_v38 = vsel %vm499_vm1, %v427_v33, %v481_v35  ;;  %v482_v42 = vrot.slane %v428_v37, 3  ;;  %v694_v33 = vsel %vm503_vm2, %v435_v17, %v489_v25 }
  0x3a   : > { %v624_v44 = vrot.slane %v622_v38, 1  ;;  %v637_v48 = vsel %vm499_vm1, %v429_v36, %v483_v39 }
  0x3b   : > { %v633_v50 = vsel %vm495_vm0, %v428_v37, %v482_v42  ;;  %v696_v37 = vrot.slane %v694_v33, 2 }
  0x40   : > { %v783_v51 = vld [vmem:[#allocation1] sm:$0xff] }
  0x41   : > { %785 = vst [vmem:[#allocation1] ss:$9 sm:$0xff] %v549_v46 }
  0x42   : > { %2045 = vmatmul.msk.bf16.gmra.mxu0 %vm907_vm4, %v783_v51  ;;  %786 = vst [vmem:[#allocation1 + $0x1] ss:$9 sm:$0xff] %v552_v49  ;;  %v640_v49 = vsel %vm503_vm2, %v429_v36, %v483_v39  ;;  %v636_v51 = vsel %vm495_vm0, %v429_v36, %v483_v39 }
  0x43   : > { %787 = vst [vmem:[#allocation1 + $0x2] ss:$9 sm:$0xff] %v555_v52  ;;  %v639_v52 = vrot.slane %v637_v48, 1  ;;  %v438_v48 = vld [vmem:[%s2423_s23 + $0x60] sm:$0xf] }
  0x44   : > { %789 = vst [vmem:[#allocation1 + $0x3] ss:$9 sm:$0xff] %v558_v53  ;;  %v642_v53 = vrot.slane %v640_v49, 2 }
  0x45   : > { %791 = vst [vmem:[#allocation1 + $0x4] ss:$9 sm:$0xff] %v561_v54  ;;  %v430_v54 = vld [vmem:[%s2423_s23 + $0x40] sm:$0xf] }
  0x46   : > { %793 = vst [vmem:[#allocation1 + $0x5] ss:$9 sm:$0xff] %v564_v56  ;;  %v484_v55 = vrot.slane %v430_v54, 3  ;;  %v432_v56 = vld [vmem:[%s2423_s23 + $0x48] sm:$0xf] }
  0x47   : > { %794 = vst [vmem:[#allocation1 + $0x6] ss:$9 sm:$0xff] %v567_v57  ;;  %v643_v57 = vsel %vm507_vm3, %v429_v36, %v483_v39  ;;  %v486_v60 = vrot.slane %v432_v56, 3  ;;  %v437_v36 = vld [vmem:[%s2423_s23 + $0x5c] sm:$0x1] }
  0x48   : > { %796 = vst [vmem:[#allocation1 + $0x7] ss:$9 sm:$0xff] %v570_v58  ;;  %v431_v58 = vld [vmem:[%s2423_s23 + $0x44] sm:$0x1]  ;;  %v649_v59 = vsel %vm499_vm1, %v430_v54, %v484_v55  ;;  %v645_v61 = vrot.slane %v643_v57, 3  ;;  %v652_v62 = vsel %vm503_vm2, %v430_v54, %v484_v55  ;;  %v655_v63 = vsel %vm507_vm3, %v430_v54, %v484_v55 }
  0x49   : > { %v485_v0 = vrot.slane %v431_v58, 3  ;;  %v651_v2 = vrot.slane %v649_v59, 1  ;;  %v654_v4 = vrot.slane %v652_v62, 2  ;;  %v657_v5 = vrot.slane %v655_v63, 3 }
  0x4a   : > { %v663_v8 = vsel %vm495_vm0, %v432_v56, %v486_v60 }
  0x4f   : > { %v797_v6 = vld [vmem:[#allocation1] sm:$0xff] }
  0x50   : > { %799 = vst [vmem:[#allocation1] ss:$9 sm:$0xff] %v573_v1  ;;  %v648_v1 = vsel %vm495_vm0, %v430_v54, %v484_v55 }
  0x51   : > { %801 = vst [vmem:[#allocation1 + $0x1] ss:$9 sm:$0xff] %v576_v3 }
  0x52   : > { %2046 = vmatmul.msk.bf16.gmra.mxu0 %vm907_vm4, %v797_v6  ;;  %802 = vst [vmem:[#allocation1 + $0x2] ss:$9 sm:$0xff] %v579_v7  ;;  %v664_v6 = vsel %vm499_vm1, %v432_v56, %v486_v60  ;;  %v660_v7 = vsel %vm495_vm0, %v431_v58, %v485_v0 }
  0x53   : > { %803 = vst [vmem:[#allocation1 + $0x3] ss:$9 sm:$0xff] %v582_v10  ;;  %v666_v9 = vrot.slane %v664_v6, 1  ;;  %v433_v10 = vld [vmem:[%s2423_s23 + $0x4c] sm:$0xf] }
  0x54   : > { %805 = vst [vmem:[#allocation1 + $0x4] ss:$9 sm:$0xff] %v585_v11  ;;  %v487_v11 = vrot.slane %v433_v10, 3  ;;  %v2543_v6 = vld [vmem:[%s2913_s3] ss:$0 sm:$0xff] }
  0x55   : > { %807 = vst [vmem:[#allocation1 + $0x5] ss:$9 sm:$0xff] %v588_v12  ;;  %v667_v12 = vsel %vm503_vm2, %v432_v56, %v486_v60 }
  0x56   : > { %809 = vst [vmem:[#allocation1 + $0x6] ss:$9 sm:$0xff] %v591_v13  ;;  %v670_v13 = vsel %vm507_vm3, %v432_v56, %v486_v60  ;;  %v669_v15 = vrot.slane %v667_v12, 2  ;;  %v676_v16 = vsel %vm499_vm1, %v433_v10, %v487_v11  ;;  %v679_v19 = vsel %vm503_vm2, %v433_v10, %v487_v11 }
  0x57   : > { %810 = vst [vmem:[#allocation1 + $0x7] ss:$9 sm:$0xff] %v594_v14  ;;  %v434_v14 = vld [vmem:[%s2423_s23 + $0x50] sm:$0x1]  ;;  %v672_v18 = vrot.slane %v670_v13, 3  ;;  %v682_v20 = vsel %vm507_vm3, %v433_v10, %v487_v11 }
  0x58   : > { %v684_v27 = vrot.slane %v682_v20, 3 }
  0x5e   : > { %v811_v26 = vld [vmem:[#allocation1] sm:$0xff] }
  0x5f   : > { %813 = vst [vmem:[#allocation1] ss:$9 sm:$0xff] %v597_v22  ;;  %v488_v22 = vrot.slane %v434_v14, 3 }
  0x60   : > { %815 = vst [vmem:[#allocation1 + $0x1] ss:$9 sm:$0xff] %v600_v23  ;;  %v675_v23 = vsel %vm495_vm0, %v433_v10, %v487_v11 }
  0x61   : > { %817 = vst [vmem:[#allocation1 + $0x2] ss:$9 sm:$0xff] %v603_v24  ;;  %v678_v24 = vrot.slane %v676_v16, 1 }
  0x62   : > { %2047 = vmatmul.msk.bf16.gmra.mxu0 %vm907_vm4, %v811_v26  ;;  %818 = vst [vmem:[#allocation1 + $0x3] ss:$9 sm:$0xff] %v606_v28  ;;  %v681_v26 = vrot.slane %v679_v19, 2  ;;  %v687_v28 = vsel %vm495_vm0, %v434_v14, %v488_v22  ;;  %v1104_v19 = vlaneseq }
  0x63   : > { %819 = vst [vmem:[#allocation1 + $0x4] ss:$9 sm:$0xff] %v609_v30  ;;  %v436_v30 = vld [vmem:[%s2423_s23 + $0x58] sm:$0xf] }
  0x64   : > { %821 = vst [vmem:[#allocation1 + $0x5] ss:$9 sm:$0xff] %v612_v31  ;;  %v490_v31 = vrot.slane %v436_v30, 3 }
  0x65   : > { %823 = vst [vmem:[#allocation1 + $0x6] ss:$9 sm:$0xff] %v615_v32  ;;  %v691_v32 = vsel %vm499_vm1, %v435_v17, %v489_v25 }
  0x66   : > { %825 = vst [vmem:[#allocation1 + $0x7] ss:$9 sm:$0xff] %v618_v34  ;;  %v697_v34 = vsel %vm507_vm3, %v435_v17, %v489_v25  ;;  %v693_v35 = vrot.slane %v691_v32, 1  ;;  %v703_v38 = vsel %vm499_vm1, %v436_v30, %v490_v31  ;;  %v706_v40 = vsel %vm503_vm2, %v436_v30, %v490_v31 }
  0x67   : > { %v699_v39 = vrot.slane %v697_v34, 3  ;;  %v709_v42 = vsel %vm507_vm3, %v436_v30, %v490_v31 }
  0x6d   : > { %v826_v46 = vld [vmem:[#allocation1] sm:$0xff] }
  0x6e   : > { %827 = vst [vmem:[#allocation1] ss:$9 sm:$0xff] %v621_v43  ;;  %v491_v43 = vrot.slane %v437_v36, 3 }
  0x6f   : > { %829 = vst [vmem:[#allocation1 + $0x1] ss:$9 sm:$0xff] %v624_v44  ;;  %v702_v44 = vsel %vm495_vm0, %v436_v30, %v490_v31 }
  0x70   : > { %831 = vst [vmem:[#allocation1 + $0x2] ss:$9 sm:$0xff] %v627_v45  ;;  %v705_v45 = vrot.slane %v703_v38, 1  ;;  %v714_v49 = vsel %vm495_vm0, %v437_v36, %v491_v43 }
  0x71   : > { %833 = vst [vmem:[#allocation1 + $0x3] ss:$9 sm:$0xff] %v630_v47  ;;  %v711_v47 = vrot.slane %v709_v42, 3 }
  0x72   : > { %2048 = vmatmul.msk.bf16.gmra.mxu0 %vm907_vm4, %v826_v46  ;;  %834 = vst [vmem:[#allocation1 + $0x4] ss:$9 sm:$0xff] %v633_v50  ;;  %v708_v46 = vrot.slane %v706_v40, 2  ;;  %v492_v50 = vrot.slane %v438_v48, 3 }
  0x73   : > { %835 = vst [vmem:[#allocation1 + $0x5] ss:$9 sm:$0xff] %v636_v51  ;;  %v439_v51 = vld [vmem:[%s2423_s23 + $0x64] sm:$0xf] }
  0x74   : > { %837 = vst [vmem:[#allocation1 + $0x6] ss:$9 sm:$0xff] %v639_v52  ;;  %v493_v52 = vrot.slane %v439_v51, 3  ;;  %v721_v54 = vsel %vm503_vm2, %v438_v48, %v492_v50  ;;  %v724_v55 = vsel %vm507_vm3, %v438_v48, %v492_v50  ;;  %v717_v56 = vsel %vm495_vm0, %v438_v48, %v492_v50 }
  0x75   : > { %839 = vst [vmem:[#allocation1 + $0x7] ss:$9 sm:$0xff] %v642_v53  ;;  %v718_v53 = vsel %vm499_vm1, %v438_v48, %v492_v50  ;;  %v723_v58 = vrot.slane %v721_v54, 2 }
  0x76   : > { %v720_v57 = vrot.slane %v718_v53, 1  ;;  %v730_v59 = vsel %vm499_vm1, %v439_v51, %v493_v52  ;;  %v733_v62 = vsel %vm503_vm2, %v439_v51, %v493_v52  ;;  %v736_v63 = vsel %vm507_vm3, %v439_v51, %v493_v52 }
  0x77   : > { %v729_v0 = vsel %vm495_vm0, %v439_v51, %v493_v52  ;;  %vm1367_vm1 = vcmask 58368   ;;  %vm1421_vm3 = vcmask 1043456  }
  0x7c   : > { %v840_v3 = vld [vmem:[#allocation1] sm:$0xff] }
  0x7d   : > { %842 = vst [vmem:[#allocation1] ss:$9 sm:$0xff] %v645_v61  ;;  %v726_v61 = vrot.slane %v724_v55, 3 }
  0x7e   : > { %843 = vst [vmem:[#allocation1 + $0x1] ss:$9 sm:$0xff] %v648_v1  ;;  %v732_v1 = vrot.slane %v730_v59, 1 }
  0x7f   : > { %845 = vst [vmem:[#allocation1 + $0x2] ss:$9 sm:$0xff] %v651_v2  ;;  %v735_v2 = vrot.slane %v733_v62, 2 }
  0x80   : > { %847 = vst [vmem:[#allocation1 + $0x3] ss:$9 sm:$0xff] %v654_v4 }
  0x81   : > { %849 = vst [vmem:[#allocation1 + $0x4] ss:$9 sm:$0xff] %v657_v5  ;;  %v440_v5 = vld [vmem:[%s2423_s23 + $0x68] sm:$0x1]  ;;  %s2037_s23 = sshll.u32 %s2265_s16, 3 }
  0x82   : > { %2049 = vmatmul.msk.bf16.gmra.mxu0 %vm907_vm4, %v840_v3  ;;  %850 = vst [vmem:[#allocation1 + $0x5] ss:$9 sm:$0xff] %v660_v7  ;;  %v738_v3 = vrot.slane %v736_v63, 3  ;;  %v494_v7 = vrot.slane %v440_v5, 3  ;;  %v2552_v25 = vstv %s2037_s23  ;;  %s402_s23 = scalar_select %p401_p13, %s2836_s12, 7 }
  0x83   : > { %851 = vst [vmem:[#allocation1 + $0x6] ss:$9 sm:$0xff] %v663_v8  ;;  %vm1108_vm5 = vcmp.lt.s32.totalorder %v2552_v25, 1  ;;  %vm1117_vm6 = vcmp.gt.s32.totalorder %v2552_v25, 16  ;;  %s1892_s12 = scalar_lea.sflag [#allocation4], %s390_s30 }
  0x84   : > { %853 = vst [vmem:[#allocation1 + $0x7] ss:$9 sm:$0xff] %v666_v9  ;;  %v741_v9 = vsel %vm495_vm0, %v440_v5, %v494_v7  ;;  %vm2558_vm7 = vmor %vm1108_vm5, %vm1117_vm6  ;;  %s404_s25 = sadd.s32 %s2035_s21, %s402_s23  ;;  %s2100_s23 = sshll.u32 %s1903_s24, 3 }
  0x85   : > { %s2036_s28 = sshll.u32 %s404_s25, 2  ;;  %s2207_s25 = scalar_lea.hbm %s2920_s10, 128 }
  0x86   : > { %s406_s16 = scalar_lea.vmem %s2911_s1, %s2036_s28  ;;  %s1905_s28 = scalar_lea.hbm %s2920_s10, %s2100_s23 }
  0x8b   : > { %v854_v21 = vld [vmem:[#allocation1] sm:$0xff] }
  0x8c   : > { %856 = vst [vmem:[#allocation1] ss:$9 sm:$0xff] %v669_v15 }
  0x8d   : > { %858 = vst [vmem:[#allocation1 + $0x1] ss:$9 sm:$0xff] %v672_v18 }
  0x8e   : > { %859 = vst [vmem:[#allocation1 + $0x2] ss:$9 sm:$0xff] %v675_v23 }
  0x8f   : > { %861 = vst [vmem:[#allocation1 + $0x3] ss:$9 sm:$0xff] %v678_v24 }
  0x90   : > { %863 = vst [vmem:[#allocation1 + $0x4] ss:$9 sm:$0xff] %v681_v26 }
  0x91   : > { %865 = vst [vmem:[#allocation1 + $0x5] ss:$9 sm:$0xff] %v684_v27  ;;  %v2554_v27 = vshrl.u32 %v1104_v19, 7 }
  0x92   : > { %2050 = vmatmul.msk.bf16.gmra.mxu0 %vm907_vm4, %v854_v21  ;;  %866 = vst [vmem:[#allocation1 + $0x6] ss:$9 sm:$0xff] %v687_v28 }
  0x93   : > { %867 = vst [vmem:[#allocation1 + $0x7] ss:$9 sm:$0xff] %v690_v29  ;;  %vm1135_vm8 = vcmp.lt.s32.totalorder %v2554_v27, 1  ;;  %v2574_v40 = vadd.s32 16, %v2554_v27 }
  0x94   : > { %vm1138_vm9 = vmor %vm2558_vm7, %vm1135_vm8 }
  0x95   : > { %vm1167_vm13 = vcmp.gt.s32.totalorder %v2574_v40, 16 }
  0x96   : > { %vm1170_vm15 = vmor %vm2558_vm7, %vm1167_vm13 }
  0x9a   : > { %v868_v41 = vld [vmem:[#allocation1] sm:$0xff] }
  0x9b   : > { %870 = vst [vmem:[#allocation1] ss:$9 sm:$0xff] %v693_v35 }
  0x9c   : > { %872 = vst [vmem:[#allocation1 + $0x1] ss:$9 sm:$0xff] %v696_v37  ;;  %v1096_v37 = vadd.s32 1, %v2552_v25 }
  0x9d   : > { %874 = vst [vmem:[#allocation1 + $0x2] ss:$9 sm:$0xff] %v699_v39 }
  0x9e   : > { %875 = vst [vmem:[#allocation1 + $0x3] ss:$9 sm:$0xff] %v702_v44  ;;  %vm1109_vm11 = vcmp.lt.s32.totalorder %v1096_v37, 1  ;;  %vm1118_vm12 = vcmp.gt.s32.totalorder %v1096_v37, 16 }
  0x9f   : > { %877 = vst [vmem:[#allocation1 + $0x4] ss:$9 sm:$0xff] %v705_v45  ;;  %vm2579_vm14 = vmor %vm1109_vm11, %vm1118_vm12 }
  0xa0   : > { %879 = vst [vmem:[#allocation1 + $0x5] ss:$9 sm:$0xff] %v708_v46  ;;  %vm1141_vm0 = vmor %vm2579_vm14, %vm1135_vm8 }
  0xa1   : > { %881 = vst [vmem:[#allocation1 + $0x6] ss:$9 sm:$0xff] %v711_v47  ;;  %vm2611_vm6 = vmor %vm2579_vm14, %vm1167_vm13 }
  0xa2   : > { %2051 = vmatmul.msk.bf16.gmra.mxu0 %vm907_vm4, %v868_v41  ;;  %882 = vst [vmem:[#allocation1 + $0x7] ss:$9 sm:$0xff] %v714_v49 }
  0xa9   : > { %v883_v60 = vld [vmem:[#allocation1] sm:$0xff] }
  0xaa   : > { %884 = vst [vmem:[#allocation1] ss:$9 sm:$0xff] %v717_v56  ;;  %v1097_v56 = vadd.s32 2, %v2552_v25 }
  0xab   : > { %886 = vst [vmem:[#allocation1 + $0x1] ss:$9 sm:$0xff] %v720_v57 }
  0xac   : > { %888 = vst [vmem:[#allocation1 + $0x2] ss:$9 sm:$0xff] %v723_v58  ;;  %vm1110_vm2 = vcmp.lt.s32.totalorder %v1097_v56, 1  ;;  %vm1119_vm5 = vcmp.gt.s32.totalorder %v1097_v56, 16 }
  0xad   : > { %890 = vst [vmem:[#allocation1 + $0x3] ss:$9 sm:$0xff] %v726_v61 }
  0xae   : > { %891 = vst [vmem:[#allocation1 + $0x4] ss:$9 sm:$0xff] %v729_v0 }
  0xaf   : > { %v939_v4 = vpop.f32.mrf.mxu0  ;;  %893 = vst [vmem:[#allocation1 + $0x5] ss:$9 sm:$0xff] %v732_v1 }
  0xb0   : > { %895 = vst [vmem:[#allocation1 + $0x6] ss:$9 sm:$0xff] %v735_v2  ;;  %v940_v8 = vadd.f32 %v2543_v6, %v939_v4  ;;  %v2055_v2 = vld [vmem:[%s2914_s4 + $0x4] sm:$0xf]  ;;  %v1402_v4 = vld [vmem:[%s2914_s4] sm:$0xf] }
  0xb1   : > { %897 = vst [vmem:[#allocation1 + $0x7] ss:$9 sm:$0xff] %v738_v3  ;;  %v1423_v3 = vsel %vm1421_vm3, %v2055_v2, 0  ;;  %v1451_v7 = vsel %vm1421_vm3, %v1402_v4, 0 }
  0xb2   : > { %2052 = vmatmul.msk.bf16.gmra.mxu0 %vm907_vm4, %v883_v60  ;;  %v993_v13 = vmax.f32 %v940_v8, 0.0  ;;  %1432 = vmatpush.bf16.msra.mxu1 %v1423_v3  ;;  %v2060_v8 = vld [vmem:[%s2914_s4 + $0x8] sm:$0xf] }
  0xb3   : > { %1460 = vmatpush.bf16.msra.mxu2 %v1451_v7  ;;  %v1102_v7 = vadd.s32 7, %v2552_v25 }
  0xb4   : > { %v1035_v18 = vrot.slane %v993_v13, 2  ;;  %v1036_v20 = vrot.slane %v993_v13, 4  ;;  %v1037_v22 = vrot.slane %v993_v13, 6 }
  0xb7   : > { %v941_v10 = vpop.f32.mrf.mxu0 }
  0xb8   : > { %v898_v11 = vld [vmem:[#allocation1] sm:$0xff]  ;;  %v942_v12 = vadd.f32 %v2543_v6, %v941_v10  ;;  %v1491_v10 = vsel %vm1421_vm3, %v2060_v8, 0 }
  0xb9   : > { %2053 = vmatmul.msk.bf16.vlgmr.msra.gmra.mxu3 %vm907_vm4, %v898_v11  ;;  %899 = vst [vmem:[#allocation1] ss:$9 sm:$0xff] %v741_v9 }
  0xba   : > { %v994_v14 = vmax.f32 %v942_v12, 0.0  ;;  %1500 = vmatpush.bf16.msrb.mxu3 %v1491_v10 }
  0xbc   : > { %v1038_v15 = vrot.slane %v994_v14, 2  ;;  %v1039_v16 = vrot.slane %v994_v14, 4  ;;  %v1040_v17 = vrot.slane %v994_v14, 6  ;;  %1203 = vst [vmem:[#allocation1 + $0x20] ss:$4 sm:$0xff] %v994_v14 }
  0xbe   : > { %1205 = vst [vmem:[#allocation1 + $0x21] ss:$4 sm:$0xff] %v1038_v15 }
  0xbf   : > { %v944_v21 = vpop.f32.mrf.mxu0  ;;  %1207 = vst [vmem:[#allocation1 + $0x22] ss:$4 sm:$0xff] %v1039_v16 }
  0xc0   : > { %v900_v23 = vld [vmem:[#allocation1] sm:$0xff]  ;;  %v945_v24 = vadd.f32 %v2543_v6, %v944_v21  ;;  %1209 = vst [vmem:[#allocation1 + $0x23] ss:$4 sm:$0xff] %v1040_v17 }
  0xc1   : > { %1195 = vst [vmem:[#allocation1] ss:$4 sm:$0xff] %v993_v13 }
  0xc2   : > { %v995_v26 = vmax.f32 %v945_v24, 0.0  ;;  %1197 = vst [vmem:[#allocation1 + $0x1] ss:$4 sm:$0xff] %v1035_v18 }
  0xc3   : > { %1199 = vst [vmem:[#allocation1 + $0x2] ss:$4 sm:$0xff] %v1036_v20 }
  0xc4   : > { %v1041_v28 = vrot.slane %v995_v26, 2  ;;  %1201 = vst [vmem:[#allocation1 + $0x3] ss:$4 sm:$0xff] %v1037_v22  ;;  %v1042_v29 = vrot.slane %v995_v26, 4  ;;  %v1043_v30 = vrot.slane %v995_v26, 6 }
  0xc7   : > { %v1211_v32 = vld.sshfl [vmem:[#allocation1 + $0x20] sm:$0xff pattern:$0x73625140]  ;;  %v946_v33 = vpop.f32.mrf.mxu0 }
  0xc8   : > { %1214 = vst [vmem:[#allocation1 + $0x20] ss:$4 sm:$0xff] %v1041_v28  ;;  %v947_v34 = vadd.f32 %v2543_v6, %v946_v33  ;;  %v1338_v35 = vsel %vm2558_vm7, 0.0, %v1211_v32  ;;  %vm2617_vm7 = vmor %vm1110_vm2, %vm1119_vm5 }
  0xc9   : > { %1215 = vst [vmem:[#allocation1 + $0x21] ss:$4 sm:$0xff] %v1042_v29  ;;  %2054 = vmatmul.msk.bf16.gmra.mxu3 %vm907_vm4, %v900_v23  ;;  %v1098_v23 = vadd.s32 3, %v2552_v25  ;;  %vm2638_vm11 = vmor %vm2617_vm7, %vm1167_vm13 }
  0xca   : > { %1216 = vst [vmem:[#allocation1 + $0x22] ss:$4 sm:$0xff] %v1043_v30  ;;  %v996_v36 = vmax.f32 %v947_v34, 0.0  ;;  %v2069_v30 = vld [vmem:[%s2914_s4 + $0x14] sm:$0xf] }
  0xcb   : > { %v1210_v38 = vld.sshfl [vmem:[#allocation1] sm:$0xff pattern:$0x73625140]  ;;  %1366 = vst.msk [vmem:[#allocation2 + $0x8] sm:$0xff] %vm1364_vm10, %v1338_v35  ;;  %vm1111_vm12 = vcmp.lt.s32.totalorder %v1098_v23, 1 }
  0xcc   : > { %1212 = vst [vmem:[#allocation1] ss:$4 sm:$0xff] %v995_v26  ;;  %v1337_v39 = vsel %vm1138_vm9, 0.0, %v1210_v38  ;;  %v1044_v42 = vrot.slane %v996_v36, 2  ;;  %v1045_v44 = vrot.slane %v996_v36, 4  ;;  %v1046_v46 = vrot.slane %v996_v36, 6  ;;  %vm1144_vm9 = vmor %vm2617_vm7, %vm1135_vm8 }
  0xcd   : > { %1217 = vst [vmem:[#allocation1 + $0x23] ss:$4 sm:$0xff] %v996_v36 }
  0xce   : > { %1365 = vst.msk [vmem:[#allocation2] sm:$0xff] %vm1364_vm10, %v1337_v39 }
  0xcf   : > { %v949_v41 = vpop.f32.mrf.mxu0 }
  0xd0   : > { %v950_v43 = vadd.f32 %v2543_v6, %v949_v41 }
  0xd2   : > { %v997_v47 = vmax.f32 %v950_v43, 0.0 }
  0xd3   : > { %v1213_v48 = vld.sshfl [vmem:[#allocation1] sm:$0xff pattern:$0x73625140] }
  0xd4   : > { %v1218_v49 = vld.sshfl [vmem:[#allocation1 + $0x20] sm:$0xff pattern:$0x73625140]  ;;  %1219 = vst [vmem:[#allocation1] ss:$4 sm:$0xff] %v1044_v42  ;;  %v1047_v50 = vrot.slane %v997_v47, 2 }
  0xd5   : > { %1220 = vst [vmem:[#allocation1 + $0x1] ss:$4 sm:$0xff] %v1045_v44  ;;  %v1339_v51 = vsel %vm1170_vm15, 0.0, %v1213_v48  ;;  %v1340_v53 = vsel %vm1141_vm0, 0.0, %v1218_v49  ;;  %v1048_v57 = vrot.slane %v997_v47, 4  ;;  %v1049_v58 = vrot.slane %v997_v47, 6 }
  0xd6   : > { %1221 = vst [vmem:[#allocation1 + $0x2] ss:$4 sm:$0xff] %v1046_v46  ;;  %v1404_v44 = vld [vmem:[#allocation2 + $0x1] ss:$2 sm:$0xff]  ;;  %v1393_v45 = vld [vmem:[#allocation2] ss:$2 sm:$0xff] }
  0xd7   : > { %1222 = vst [vmem:[#allocation1 + $0x3] ss:$4 sm:$0xff] %v997_v47  ;;  %v951_v52 = vpop.f32.mrf.mxu0 }
  0xd8   : > { %1223 = vst [vmem:[#allocation1 + $0x20] ss:$4 sm:$0xff] %v1047_v50  ;;  %v952_v54 = vadd.f32 %v2543_v6, %v951_v52 }
  0xd9   : > { %1368 = vst.msk [vmem:[#allocation2 + $0x10] sm:$0x3] %vm1367_vm1, %v1339_v51 }
  0xda   : > { %v998_v55 = vmax.f32 %v952_v54, 0.0  ;;  %1369 = vst.msk [vmem:[#allocation2 + $0x18] sm:$0xff] %vm1364_vm10, %v1340_v53 }
  0xdc   : > { %v1050_v60 = vrot.slane %v998_v55, 2  ;;  %v1051_v62 = vrot.slane %v998_v55, 4  ;;  %v1052_v0 = vrot.slane %v998_v55, 6 }
  0xde   : > { %v1224_v59 = vld.sshfl [vmem:[#allocation1] sm:$0xff pattern:$0x73625140] }
  0xdf   : > { %v1225_v61 = vld.sshfl [vmem:[#allocation1 + $0x20] sm:$0xff pattern:$0x73625140]  ;;  %1226 = vst [vmem:[#allocation1] ss:$4 sm:$0xff] %v1048_v57  ;;  %v954_v63 = vpop.f32.mrf.mxu0  ;;  %v1341_v13 = vsel %vm2579_vm14, 0.0, %v1224_v59 }
  0xe0   : > { %1227 = vst [vmem:[#allocation1 + $0x1] ss:$4 sm:$0xff] %v1049_v58  ;;  %v955_v1 = vadd.f32 %v2543_v6, %v954_v63  ;;  %v1342_v14 = vsel %vm2611_vm6, 0.0, %v1225_v61  ;;  %vm1120_vm14 = vcmp.gt.s32.totalorder %v1098_v23, 16  ;;  %v1473_v53 = vld [vmem:[#allocation2 + $0x2] ss:$2 sm:$0xff] }
  0xe1   : > { %1228 = vst [vmem:[#allocation1 + $0x2] ss:$4 sm:$0xff] %v998_v55  ;;  %vm2648_vm15 = vmor %vm1111_vm12, %vm1120_vm14  ;;  %v1099_v57 = vadd.s32 4, %v2552_v25 }
  0xe2   : > { %1229 = vst [vmem:[#allocation1 + $0x3] ss:$4 sm:$0xff] %v1050_v60  ;;  %v999_v5 = vmax.f32 %v955_v1, 0.0  ;;  %vm1147_vm0 = vmor %vm2648_vm15, %vm1135_vm8 }
  0xe3   : > { %1230 = vst [vmem:[#allocation1 + $0x20] ss:$4 sm:$0xff] %v1051_v62  ;;  %vm2667_vm2 = vmor %vm2648_vm15, %vm1167_vm13  ;;  %vm1112_vm5 = vcmp.lt.s32.totalorder %v1099_v57, 1  ;;  %vm1121_vm6 = vcmp.gt.s32.totalorder %v1099_v57, 16 }
  0xe4   : > { %1231 = vst [vmem:[#allocation1 + $0x21] ss:$4 sm:$0xff] %v1052_v0  ;;  %v1053_v11 = vrot.slane %v999_v5, 2  ;;  %v1054_v15 = vrot.slane %v999_v5, 4  ;;  %v1055_v21 = vrot.slane %v999_v5, 6 }
  0xe5   : > { %1232 = vst [vmem:[#allocation1 + $0x22] ss:$4 sm:$0xff] %v999_v5 }
  0xe6   : > { %1233 = vst [vmem:[#allocation1 + $0x23] ss:$4 sm:$0xff] %v1053_v11 }
  0xe7   : > { %v956_v16 = vpop.f32.mrf.mxu0  ;;  %1370 = vst.msk [vmem:[#allocation2 + $0x20] sm:$0xff] %vm1364_vm10, %v1341_v13 }
  0xe8   : > { %v957_v17 = vadd.f32 %v2543_v6, %v956_v16  ;;  %1371 = vst.msk [vmem:[#allocation2 + $0x28] sm:$0x3] %vm1367_vm1, %v1342_v14 }
  0xe9   : > { %v1234_v18 = vld.sshfl [vmem:[#allocation1] sm:$0xff pattern:$0x73625140] }
  0xea   : > { %1236 = vst [vmem:[#allocation1] ss:$4 sm:$0xff] %v1054_v15  ;;  %v1000_v19 = vmax.f32 %v957_v17, 0.0  ;;  %v1343_v20 = vsel %vm1144_vm9, 0.0, %v1234_v18  ;;  %v1100_v18 = vadd.s32 5, %v2552_v25 }
  0xeb   : > { %1372 = vst.msk [vmem:[#allocation2 + $0x30] sm:$0xff] %vm1364_vm10, %v1343_v20 }
  0xec   : > { %v1056_v22 = vrot.slane %v1000_v19, 2  ;;  %v1057_v26 = vrot.slane %v1000_v19, 4  ;;  %v1058_v28 = vrot.slane %v1000_v19, 6  ;;  %vm1113_vm12 = vcmp.lt.s32.totalorder %v1100_v18, 1 }
  0xed   : > { %v1235_v24 = vld.sshfl [vmem:[#allocation1 + $0x20] sm:$0xff pattern:$0x73625140]  ;;  %vm1122_vm14 = vcmp.gt.s32.totalorder %v1100_v18, 16  ;;  %v2072_v18 = vld [vmem:[%s2914_s4 + $0x18] sm:$0xf] }
  0xee   : > { %1238 = vst [vmem:[#allocation1 + $0x20] ss:$4 sm:$0xff] %v1055_v21  ;;  %v1344_v32 = vsel %vm2617_vm7, 0.0, %v1235_v24  ;;  %vm2677_vm7 = vmor %vm1112_vm5, %vm1121_vm6 }
  0xef   : > { %1239 = vst [vmem:[#allocation1 + $0x21] ss:$4 sm:$0xff] %v1000_v19  ;;  %v959_v29 = vpop.f32.mrf.mxu0  ;;  %vm1150_vm9 = vmor %vm2677_vm7, %vm1135_vm8 }
  0xf0   : > { %1240 = vst [vmem:[#allocation1 + $0x22] ss:$4 sm:$0xff] %v1056_v22  ;;  %v960_v31 = vadd.f32 %v2543_v6, %v959_v29  ;;  %v2066_v29 = vld [vmem:[%s2914_s4 + $0x10] sm:$0xf] }
  0xf1   : > { %v1237_v33 = vld.sshfl [vmem:[#allocation1] sm:$0xff pattern:$0x73625140]  ;;  %1241 = vst [vmem:[#allocation1 + $0x23] ss:$4 sm:$0xff] %v1057_v26 }
  0xf2   : > { %1243 = vst [vmem:[#allocation1] ss:$4 sm:$0xff] %v1058_v28  ;;  %v1001_v34 = vmax.f32 %v960_v31, 0.0  ;;  %v1345_v35 = vsel %vm2638_vm11, 0.0, %v1237_v33  ;;  %vm2697_vm11 = vmor %vm2677_vm7, %vm1167_vm13  ;;  %v2063_v31 = vld [vmem:[%s2914_s4 + $0xc] sm:$0xf] }
  0xf3   : > { %1373 = vst.msk [vmem:[#allocation2 + $0x38] sm:$0xff] %vm1364_vm10, %v1344_v32  ;;  %v1579_v32 = vsel %vm1421_vm3, %v2066_v29, 0  ;;  %v1623_v33 = vsel %vm1421_vm3, %v2069_v30, 0 }
  0xf4   : > { %v1059_v37 = vrot.slane %v1001_v34, 2  ;;  %v1060_v38 = vrot.slane %v1001_v34, 4  ;;  %1244 = vst [vmem:[#allocation1 + $0x1] ss:$4 sm:$0xff] %v1001_v34  ;;  %v1061_v39 = vrot.slane %v1001_v34, 6  ;;  %v1535_v34 = vsel %vm1421_vm3, %v2063_v31, 0  ;;  %1588 = vmatpush.bf16.msrb.mxu2 %v1579_v32  ;;  %1632 = vmatpush.bf16.msra.mxu3 %v1623_v33 }
  0xf5   : > { %1374 = vst.msk [vmem:[#allocation2 + $0x40] sm:$0x3] %vm1367_vm1, %v1345_v35  ;;  %1544 = vmatpush.bf16.msrb.mxu1 %v1535_v34 }
  0xf6   : > { %1245 = vst [vmem:[#allocation1 + $0x2] ss:$4 sm:$0xff] %v1059_v37 }
  0xf7   : > { %1246 = vst [vmem:[#allocation1 + $0x3] ss:$4 sm:$0xff] %v1060_v38  ;;  %v961_v41 = vpop.f32.mrf.mxu0 }
  0xf8   : > { %v1242_v42 = vld.sshfl [vmem:[#allocation1 + $0x20] sm:$0xff pattern:$0x73625140]  ;;  %v962_v43 = vadd.f32 %v2543_v6, %v961_v41 }
  0xf9   : > { %1247 = vst [vmem:[#allocation1 + $0x20] ss:$4 sm:$0xff] %v1061_v39  ;;  %v1346_v46 = vsel %vm1147_vm0, 0.0, %v1242_v42 }
  0xfa   : > { %v1002_v47 = vmax.f32 %v962_v43, 0.0  ;;  %v1406_v48 = vld [vmem:[#allocation2 + $0x31] ss:$2 sm:$0xff]  ;;  %v1395_v49 = vld [vmem:[#allocation2 + $0x30] ss:$2 sm:$0xff]  ;;  %1375 = vst.msk [vmem:[#allocation2 + $0x48] sm:$0xff] %vm1364_vm10, %v1346_v46 }
  0xfb   : > { %v1411_v50 = vpack.c.bf16 %v1406_v48, %v1404_v44  ;;  %v1400_v51 = vpack.c.bf16 %v1395_v49, %v1393_v45 }
  0xfc   : > { %v1062_v52 = vrot.slane %v1002_v47, 2  ;;  %v1475_v54 = vld [vmem:[#allocation2 + $0x32] ss:$2 sm:$0xff]  ;;  %v1063_v55 = vrot.slane %v1002_v47, 4  ;;  %v1064_v59 = vrot.slane %v1002_v47, 6 }
  0xfd   : > { %2056 = vmatmul.msk.bf16.vlgmr.msra.gmra.mxu1 %vm1364_vm10, %v1411_v50  ;;  %2058 = vmatmul.msk.bf16.vlgmr.msra.gmra.mxu2 %vm1364_vm10, %v1400_v51  ;;  %v1480_v56 = vpack.c.bf16 %v1475_v54, %v1473_v53  ;;  %v1737_v30 = vld [vmem:[#allocation2 + $0x32] ss:$2 sm:$0xff] }
  0xfe   : > { %v1248_v58 = vld.sshfl [vmem:[#allocation1] sm:$0xff pattern:$0x73625140] }
  0xff   : > { %1250 = vst [vmem:[#allocation1] ss:$4 sm:$0xff] %v1002_v47  ;;  %2061 = vmatmul.msk.bf16.vlgmr.msrb.gmra.mxu3 %vm1364_vm10, %v1480_v56  ;;  %v964_v60 = vpop.f32.mrf.mxu0  ;;  %v1347_v0 = vsel %vm2648_vm15, 0.0, %v1248_v58  ;;  %vm2715_vm15 = vmor %vm1113_vm12, %vm1122_vm14  ;;  %vm1115_vm12 = vcmp.lt.s32.totalorder %v1102_v7, 1  ;;  %vm1124_vm14 = vcmp.gt.s32.totalorder %v1102_v7, 16 }
 0x100   : > { %v1249_v62 = vld.sshfl [vmem:[#allocation1 + $0x20] sm:$0xff pattern:$0x73625140]  ;;  %1251 = vst [vmem:[#allocation1 + $0x1] ss:$4 sm:$0xff] %v1062_v52  ;;  %v965_v63 = vadd.f32 %v2543_v6, %v964_v60  ;;  %vm1153_vm0 = vmor %vm2715_vm15, %vm1135_vm8  ;;  %v1101_v52 = vadd.s32 6, %v2552_v25 }
 0x101   : > { %1252 = vst [vmem:[#allocation1 + $0x2] ss:$4 sm:$0xff] %v1063_v55  ;;  %v1348_v2 = vsel %vm2667_vm2, 0.0, %v1249_v62  ;;  %vm1185_vm2 = vmor %vm2715_vm15, %vm1167_vm13 }
 0x102   : > { %1253 = vst [vmem:[#allocation1 + $0x3] ss:$4 sm:$0xff] %v1064_v59  ;;  %v1003_v1 = vmax.f32 %v965_v63, 0.0  ;;  %vm1114_vm5 = vcmp.lt.s32.totalorder %v1101_v52, 1  ;;  %vm1123_vm6 = vcmp.gt.s32.totalorder %v1101_v52, 16 }
 0x103   : > { %1376 = vst.msk [vmem:[#allocation2 + $0x50] sm:$0xff] %vm1364_vm10, %v1347_v0 }
 0x104   : > { %v1065_v3 = vrot.slane %v1003_v1, 2  ;;  %v1066_v4 = vrot.slane %v1003_v1, 4  ;;  %v1067_v5 = vrot.slane %v1003_v1, 6  ;;  %1254 = vst [vmem:[#allocation1 + $0x20] ss:$4 sm:$0xff] %v1003_v1 }
 0x105   : > { %1377 = vst.msk [vmem:[#allocation2 + $0x58] sm:$0x3] %vm1367_vm1, %v1348_v2 }
 0x106   : > { %1255 = vst [vmem:[#allocation1 + $0x21] ss:$4 sm:$0xff] %v1065_v3 }
 0x107   : > { %1256 = vst [vmem:[#allocation1 + $0x22] ss:$4 sm:$0xff] %v1066_v4  ;;  %v966_v8 = vpop.f32.mrf.mxu0 }
 0x108   : > { %1257 = vst [vmem:[#allocation1 + $0x23] ss:$4 sm:$0xff] %v1067_v5  ;;  %v967_v9 = vadd.f32 %v2543_v6, %v966_v8 }
 0x109   : > { %v1258_v10 = vld.sshfl [vmem:[#allocation1] sm:$0xff pattern:$0x73625140] }
 0x10a   : > { %v1004_v11 = vmax.f32 %v967_v9, 0.0  ;;  %v1349_v12 = vsel %vm1150_vm9, 0.0, %v1258_v10  ;;  %v2075_v10 = vld [vmem:[%s2914_s4 + $0x1c] sm:$0xf] }
 0x10b   : > { %1378 = vst.msk [vmem:[#allocation2 + $0x60] sm:$0xff] %vm1364_vm10, %v1349_v12 }
 0x10c   : > { %v1068_v13 = vrot.slane %v1004_v11, 2  ;;  %1260 = vst [vmem:[#allocation1] ss:$4 sm:$0xff] %v1004_v11  ;;  %v1069_v14 = vrot.slane %v1004_v11, 4  ;;  %v1070_v15 = vrot.slane %v1004_v11, 6 }
 0x10f   : > { %v1259_v16 = vld.sshfl [vmem:[#allocation1 + $0x20] sm:$0xff pattern:$0x73625140]  ;;  %v969_v17 = vpop.f32.mrf.mxu0 }
 0x110   : > { %1262 = vst [vmem:[#allocation1 + $0x20] ss:$4 sm:$0xff] %v1068_v13  ;;  %v970_v19 = vadd.f32 %v2543_v6, %v969_v17  ;;  %v1350_v20 = vsel %vm2677_vm7, 0.0, %v1259_v16  ;;  %vm2736_vm7 = vmor %vm1114_vm5, %vm1123_vm6  ;;  %v1711_v13 = vsel %vm1421_vm3, %v2075_v10, 0 }
 0x111   : > { %1263 = vst [vmem:[#allocation1 + $0x21] ss:$4 sm:$0xff] %v1069_v14  ;;  %vm1156_vm9 = vmor %vm2736_vm7, %vm1135_vm8  ;;  %v2078_v14 = vld [vmem:[%s2914_s4 + $0x20] sm:$0xf]  ;;  %1720 = vmatpush.bf16.msra.mxu2 %v1711_v13 }
 0x112   : > { %1264 = vst [vmem:[#allocation1 + $0x22] ss:$4 sm:$0xff] %v1070_v15  ;;  %v1005_v21 = vmax.f32 %v970_v19, 0.0  ;;  %v1755_v17 = vsel %vm1421_vm3, %v2078_v14, 0 }
 0x113   : > { %v1261_v22 = vld.sshfl [vmem:[#allocation1] sm:$0xff pattern:$0x73625140]  ;;  %1379 = vst.msk [vmem:[#allocation2 + $0x68] sm:$0xff] %vm1364_vm10, %v1350_v20  ;;  %1764 = vmatpush.bf16.msrb.mxu3 %v1755_v17 }
 0x114   : > { %v1071_v24 = vrot.slane %v1005_v21, 2  ;;  %v1072_v26 = vrot.slane %v1005_v21, 4  ;;  %v1073_v28 = vrot.slane %v1005_v21, 6  ;;  %1265 = vst [vmem:[#allocation1 + $0x23] ss:$4 sm:$0xff] %v1005_v21  ;;  %v1351_v35 = vsel %vm2697_vm11, 0.0, %v1261_v22  ;;  %vm2757_vm11 = vmor %vm2736_vm7, %vm1167_vm13 }
 0x115   : > { %1380 = vst.msk [vmem:[#allocation2 + $0x70] sm:$0x3] %vm1367_vm1, %v1351_v35  ;;  %v1667_v21 = vsel %vm1421_vm3, %v2072_v18, 0 }
 0x116   : > { %1267 = vst [vmem:[#allocation1] ss:$4 sm:$0xff] %v1071_v24  ;;  %1676 = vmatpush.bf16.msra.mxu1 %v1667_v21 }
 0x117   : > { %v971_v37 = vpop.f32.mrf.mxu0  ;;  %1268 = vst [vmem:[#allocation1 + $0x1] ss:$4 sm:$0xff] %v1072_v26 }
 0x118   : > { %v972_v38 = vadd.f32 %v2543_v6, %v971_v37  ;;  %1269 = vst [vmem:[#allocation1 + $0x2] ss:$4 sm:$0xff] %v1073_v28 }
 0x11a   : > { %v1006_v39 = vmax.f32 %v972_v38, 0.0  ;;  %v1408_v29 = vld [vmem:[#allocation2 + $0x61] ss:$2 sm:$0xff]  ;;  %v1397_v33 = vld [vmem:[#allocation2 + $0x60] ss:$2 sm:$0xff] }
 0x11b   : > { %v1266_v41 = vld.sshfl [vmem:[#allocation1 + $0x20] sm:$0xff pattern:$0x73625140]  ;;  %v1651_v21 = vld [vmem:[#allocation2 + $0x60] ss:$2 sm:$0xff] }
 0x11c   : > { %v1074_v42 = vrot.slane %v1006_v39, 2  ;;  %1270 = vst [vmem:[#allocation1 + $0x3] ss:$4 sm:$0xff] %v1006_v39  ;;  %v1352_v43 = vsel %vm1153_vm0, 0.0, %v1266_v41  ;;  %v1075_v46 = vrot.slane %v1006_v39, 4  ;;  %v1076_v48 = vrot.slane %v1006_v39, 6 }
 0x11d   : > { %1381 = vst.msk [vmem:[#allocation2 + $0x78] sm:$0xff] %vm1364_vm10, %v1352_v43  ;;  %v1477_v39 = vld [vmem:[#allocation2 + $0x62] ss:$2 sm:$0xff] }
 0x11e   : > { %1271 = vst [vmem:[#allocation1 + $0x20] ss:$4 sm:$0xff] %v1074_v42 }
 0x11f   : > { %v974_v44 = vpop.f32.mrf.mxu0 }
 0x120   : > { %v975_v45 = vadd.f32 %v2543_v6, %v974_v44 }
 0x122   : > { %v1007_v47 = vmax.f32 %v975_v45, 0.0 }
 0x123   : > { %v1272_v49 = vld.sshfl [vmem:[#allocation1] sm:$0xff pattern:$0x73625140] }
 0x124   : > { %v1078_v50 = vrot.slane %v1007_v47, 4  ;;  %v1079_v51 = vrot.slane %v1007_v47, 6  ;;  %1274 = vst [vmem:[#allocation1] ss:$4 sm:$0xff] %v1075_v46  ;;  %v1077_v54 = vrot.slane %v1007_v47, 2  ;;  %v1353_v56 = vsel %vm2715_vm15, 0.0, %v1272_v49  ;;  %vm2775_vm15 = vmor %vm1115_vm12, %vm1124_vm14 }
 0x125   : > { %v1273_v53 = vld.sshfl [vmem:[#allocation1 + $0x20] sm:$0xff pattern:$0x73625140]  ;;  %1275 = vst [vmem:[#allocation1 + $0x1] ss:$4 sm:$0xff] %v1076_v48  ;;  %vm1159_vm0 = vmor %vm2775_vm15, %vm1135_vm8  ;;  %v1103_v48 = vadd.s32 8, %v2552_v25 }
 0x126   : > { %1278 = vst [vmem:[#allocation1 + $0x20] ss:$4 sm:$0xff] %v1078_v50  ;;  %v1354_v58 = vsel %vm1185_vm2, 0.0, %v1273_v53  ;;  %vm1191_vm2 = vmor %vm2775_vm15, %vm1167_vm13 }
 0x127   : > { %1279 = vst [vmem:[#allocation1 + $0x21] ss:$4 sm:$0xff] %v1079_v51  ;;  %v976_v55 = vpop.f32.mrf.mxu0  ;;  %vm1116_vm5 = vcmp.lt.s32.totalorder %v1103_v48, 1  ;;  %vm1125_vm6 = vcmp.gt.s32.totalorder %v1103_v48, 16 }
 0x128   : > { %v977_v57 = vadd.f32 %v2543_v6, %v976_v55  ;;  %1276 = vst [vmem:[#allocation1 + $0x2] ss:$4 sm:$0xff] %v1007_v47  ;;  %v1519_v55 = vld [vmem:[#allocation2 + $0x48] ss:$2 sm:$0xff] }
 0x129   : > { %1277 = vst [vmem:[#allocation1 + $0x3] ss:$4 sm:$0xff] %v1077_v54 }
 0x12a   : > { %v1008_v59 = vmax.f32 %v977_v57, 0.0  ;;  %1382 = vst.msk [vmem:[#allocation2 + $0x80] sm:$0xff] %vm1364_vm10, %v1353_v56 }
 0x12b   : > { %1383 = vst.msk [vmem:[#allocation2 + $0x88] sm:$0x3] %vm1367_vm1, %v1354_v58 }
 0x12c   : > { %v1080_v61 = vrot.slane %v1008_v59, 2  ;;  %1280 = vst [vmem:[#allocation1 + $0x22] ss:$4 sm:$0xff] %v1008_v59  ;;  %v1081_v62 = vrot.slane %v1008_v59, 4  ;;  %v1082_v4 = vrot.slane %v1008_v59, 6 }
 0x12d   : > { %v1563_v59 = vld [vmem:[#allocation2 + $0x49] ss:$2 sm:$0xff] }
 0x12e   : > { %1281 = vst [vmem:[#allocation1 + $0x23] ss:$4 sm:$0xff] %v1080_v61 }
 0x12f   : > { %v979_v63 = vpop.f32.mrf.mxu0 }
 0x130   : > { %v980_v0 = vadd.f32 %v2543_v6, %v979_v63  ;;  %v1282_v1 = vld.sshfl [vmem:[#allocation1] sm:$0xff pattern:$0x73625140] }
 0x131   : > { %v1355_v2 = vsel %vm1156_vm9, 0.0, %v1282_v1  ;;  %1284 = vst [vmem:[#allocation1] ss:$4 sm:$0xff] %v1081_v62  ;;  %v1517_v63 = vld [vmem:[#allocation2 + $0x18] ss:$2 sm:$0xff] }
 0x132   : > { %v1009_v3 = vmax.f32 %v980_v0, 0.0  ;;  %1384 = vst.msk [vmem:[#allocation2 + $0x90] sm:$0xff] %vm1364_vm10, %v1355_v2  ;;  %v1561_v0 = vld [vmem:[#allocation2 + $0x19] ss:$2 sm:$0xff]  ;;  %v1524_v2 = vpack.c.bf16 %v1519_v55, %v1517_v63  ;;  %v1609_v40 = vld [vmem:[#allocation2 + $0x7a] ss:$2 sm:$0xff] }
 0x134   : > { %v1083_v5 = vrot.slane %v1009_v3, 2  ;;  %v1084_v8 = vrot.slane %v1009_v3, 4  ;;  %v1085_v15 = vrot.slane %v1009_v3, 6 }
 0x135   : > { %v1283_v9 = vld.sshfl [vmem:[#allocation1 + $0x20] sm:$0xff pattern:$0x73625140] }
 0x136   : > { %v1356_v11 = vsel %vm2736_vm7, 0.0, %v1283_v9  ;;  %1286 = vst [vmem:[#allocation1 + $0x20] ss:$4 sm:$0xff] %v1082_v4  ;;  %vm2800_vm7 = vmor %vm1116_vm5, %vm1125_vm6  ;;  %v1607_v4 = vld [vmem:[#allocation2 + $0x4a] ss:$2 sm:$0xff] }
 0x137   : > { %v981_v16 = vpop.f32.mrf.mxu0  ;;  %1385 = vst.msk [vmem:[#allocation2 + $0x98] sm:$0xff] %vm1364_vm10, %v1356_v11  ;;  %vm1162_vm9 = vmor %vm2800_vm7, %vm1135_vm8 }
 0x138   : > { %v982_v19 = vadd.f32 %v2543_v6, %v981_v16  ;;  %1287 = vst [vmem:[#allocation1 + $0x21] ss:$4 sm:$0xff] %v1009_v3  ;;  %v1285_v20 = vld.sshfl [vmem:[#allocation1] sm:$0xff pattern:$0x73625140]  ;;  %v1568_v3 = vpack.c.bf16 %v1563_v59, %v1561_v0  ;;  %vm1194_vm8 = vmor %vm2800_vm7, %vm1167_vm13 }
 0x139   : > { %1288 = vst [vmem:[#allocation1 + $0x22] ss:$4 sm:$0xff] %v1083_v5  ;;  %v1357_v22 = vsel %vm2757_vm11, 0.0, %v1285_v20  ;;  %v1565_v16 = vld [vmem:[#allocation2 + $0x79] ss:$2 sm:$0xff] }
 0x13a   : > { %v1010_v23 = vmax.f32 %v982_v19, 0.0  ;;  %1289 = vst [vmem:[#allocation1 + $0x23] ss:$4 sm:$0xff] %v1084_v8 }
 0x13b   : > { %1386 = vst.msk [vmem:[#allocation2 + $0xa0] sm:$0x3] %vm1367_vm1, %v1357_v22  ;;  %v1695_v22 = vld [vmem:[#allocation2 + $0x61] ss:$2 sm:$0xff] }
 0x13c   : > { %v1086_v24 = vrot.slane %v1010_v23, 2  ;;  %v1087_v26 = vrot.slane %v1010_v23, 4  ;;  %v984_v28 = vpop.f32.mrf.mxu3  ;;  %1291 = vst [vmem:[#allocation1] ss:$4 sm:$0xff] %v1085_v15  ;;  %v1088_v31 = vrot.slane %v1010_v23, 6 }
 0x13d   : > { %v985_v32 = vadd.f32 %v2543_v6, %v984_v28  ;;  %1292 = vst [vmem:[#allocation1 + $0x1] ss:$4 sm:$0xff] %v1010_v23  ;;  %v1521_v15 = vld [vmem:[#allocation2 + $0x78] ss:$2 sm:$0xff] }
 0x13e   : > { %v1410_v34 = vld [vmem:[#allocation2 + $0x91] ss:$2 sm:$0xff]  ;;  %v1399_v35 = vld [vmem:[#allocation2 + $0x90] ss:$2 sm:$0xff]  ;;  %1293 = vst [vmem:[#allocation1 + $0x2] ss:$4 sm:$0xff] %v1086_v24 }
 0x13f   : > { %v1412_v36 = vpack.c.bf16 %v1410_v34, %v1408_v29  ;;  %v1401_v37 = vpack.c.bf16 %v1399_v35, %v1397_v33  ;;  %1294 = vst [vmem:[#allocation1 + $0x3] ss:$4 sm:$0xff] %v1087_v26  ;;  %v1011_v38 = vmax.f32 %v985_v32, 0.0  ;;  %v1649_v23 = vld [vmem:[#allocation2 + $0x30] ss:$2 sm:$0xff] }
 0x140   : > { %v1693_v24 = vld [vmem:[#allocation2 + $0x31] ss:$2 sm:$0xff]  ;;  %v1656_v26 = vpack.c.bf16 %v1651_v21, %v1649_v23  ;;  %v1739_v29 = vld [vmem:[#allocation2 + $0x62] ss:$2 sm:$0xff] }
 0x141   : > { %2057 = vmatmul.msk.bf16.gmra.mxu1 %vm1364_vm10, %v1412_v36  ;;  %2059 = vmatmul.msk.bf16.gmra.mxu2 %vm1364_vm10, %v1401_v37  ;;  %v1290_v41 = vld.sshfl [vmem:[#allocation1 + $0x20] sm:$0xff pattern:$0x73625140]  ;;  %v1089_v46 = vrot.slane %v1011_v38, 2  ;;  %v1090_v49 = vrot.slane %v1011_v38, 4  ;;  %v1091_v51 = vrot.slane %v1011_v38, 6  ;;  %v1700_v28 = vpack.c.bf16 %v1695_v22, %v1693_v24 }
 0x142   : > { %v1479_v42 = vld [vmem:[#allocation2 + $0x92] ss:$2 sm:$0xff]  ;;  %v1358_v43 = vsel %vm1159_vm0, 0.0, %v1290_v41  ;;  %1295 = vst [vmem:[#allocation1 + $0x20] ss:$4 sm:$0xff] %v1088_v31  ;;  %v1744_v31 = vpack.c.bf16 %v1739_v29, %v1737_v30 }
 0x143   : > { %v1481_v44 = vpack.c.bf16 %v1479_v42, %v1477_v39  ;;  %1387 = vst.msk [vmem:[#allocation2 + $0xa8] sm:$0xff] %vm1364_vm10, %v1358_v43  ;;  %v1653_v34 = vld [vmem:[#allocation2 + $0x90] ss:$2 sm:$0xff]  ;;  %v1697_v35 = vld [vmem:[#allocation2 + $0x91] ss:$2 sm:$0xff] }
 0x144   : > { %v986_v45 = vpop.f32.mrf.mxu3  ;;  %v1741_v39 = vld [vmem:[#allocation2 + $0x92] ss:$2 sm:$0xff] }
 0x145   : > { %v987_v47 = vadd.f32 %v2543_v6, %v986_v45  ;;  %2062 = vmatmul.msk.bf16.gmra.mxu3 %vm1364_vm10, %v1481_v44 }
 0x146   : > { %v1296_v50 = vld.sshfl [vmem:[#allocation1] sm:$0xff pattern:$0x73625140] }
 0x147   : > { %v1012_v52 = vmax.f32 %v987_v47, 0.0  ;;  %v1359_v53 = vsel %vm2775_vm15, 0.0, %v1296_v50  ;;  %1298 = vst [vmem:[#allocation1] ss:$4 sm:$0xff] %v1011_v38 }
 0x148   : > { %1388 = vst.msk [vmem:[#allocation2 + $0xb0] sm:$0xff] %vm1364_vm10, %v1359_v53  ;;  %v1794_v53 = vld [vmem:[%s2916_s6] sm:$0xf] }
 0x149   : > { %1299 = vst [vmem:[#allocation1 + $0x1] ss:$4 sm:$0xff] %v1089_v46  ;;  %v1092_v54 = vrot.slane %v1012_v52, 2  ;;  %v1297_v25 = vld.sshfl [vmem:[#allocation1 + $0x20] sm:$0xff pattern:$0x73625140] }
 0x14a   : > { %1300 = vst [vmem:[#allocation1 + $0x2] ss:$4 sm:$0xff] %v1090_v49  ;;  %v1360_v56 = vsel %vm1191_vm2, 0.0, %v1297_v25  ;;  %v1093_v57 = vrot.slane %v1012_v52, 4  ;;  %v1094_v60 = vrot.slane %v1012_v52, 6  ;;  %v2107_v49 = vld [vmem:[%s2918_s8] sm:$0xff] }
 0x14b   : > { %1301 = vst [vmem:[#allocation1 + $0x3] ss:$4 sm:$0xff] %v1091_v51 }
 0x14c   : > { %v989_v58 = vpop.f32.mrf.mxu3  ;;  %1389 = vst.msk [vmem:[#allocation2 + $0xb8] sm:$0x3] %vm1367_vm1, %v1360_v56 }
 0x14d   : > { %v990_v61 = vadd.f32 %v2543_v6, %v989_v58  ;;  %1302 = vst [vmem:[#allocation1 + $0x20] ss:$4 sm:$0xff] %v1012_v52  ;;  %v1605_v6 = vld [vmem:[#allocation2 + $0x1a] ss:$2 sm:$0xff] }
 0x14e   : > { %1303 = vst [vmem:[#allocation1 + $0x21] ss:$4 sm:$0xff] %v1092_v54  ;;  %v1612_v7 = vpack.c.bf16 %v1607_v4, %v1605_v6  ;;  %v1806_v54 = vsel %vm1421_vm3, %v1794_v53, 0 }
 0x14f   : > { %v1013_v1 = vmax.f32 %v990_v61, 0.0  ;;  %1304 = vst [vmem:[#allocation1 + $0x22] ss:$4 sm:$0xff] %v1093_v57  ;;  %v1523_v13 = vld [vmem:[#allocation2 + $0xa8] ss:$2 sm:$0xff]  ;;  %v2105_v61 = vld [vmem:[%s406_s16] sm:$0xff] }
 0x150   : > { %1305 = vst [vmem:[#allocation1 + $0x23] ss:$4 sm:$0xff] %v1094_v60  ;;  %v1567_v14 = vld [vmem:[#allocation2 + $0xa9] ss:$2 sm:$0xff]  ;;  %v1525_v17 = vpack.c.bf16 %v1523_v13, %v1521_v15 }
 0x151   : > { %2064 = vmatmul.msk.bf16.vlgmr.msrb.gmra.mxu1 %vm1364_vm10, %v1524_v2  ;;  %2067 = vmatmul.msk.bf16.vlgmr.msrb.gmra.mxu2 %vm1364_vm10, %v1568_v3  ;;  %v1569_v18 = vpack.c.bf16 %v1567_v14, %v1565_v16 }
 0x152   : > { %v1306_v5 = vld.sshfl [vmem:[#allocation1] sm:$0xff pattern:$0x73625140]  ;;  %1866 = vmatpush.bf16.msrb.mxu2 %v2107_v49  ;;  %1815 = vmatpush.bf16.msrb.mxu1 %v1806_v54 }
 0x153   : > { %v1361_v8 = vsel %vm1162_vm9, 0.0, %v1306_v5  ;;  %1308 = vst [vmem:[#allocation1] ss:$4 sm:$0xff] %v1013_v1  ;;  %v1611_v19 = vld [vmem:[#allocation2 + $0xaa] ss:$2 sm:$0xff] }
 0x154   : > { %v991_v9 = vpop.f32.mrf.mxu3  ;;  %1390 = vst.msk [vmem:[#allocation2 + $0xc0] sm:$0xff] %vm1364_vm10, %v1361_v8  ;;  %v1613_v20 = vpack.c.bf16 %v1611_v19, %v1609_v40 }
 0x155   : > { %2070 = vmatmul.msk.bf16.vlgmr.msra.gmra.mxu3 %vm1364_vm10, %v1612_v7  ;;  %v2106_v7 = vld [vmem:[%s406_s16 + $0x8] sm:$0xff]  ;;  %s392_s16 = scalar_lea.vmem [#allocation3], %s2032_s29  ;;  %s1908_s29 = sshll.u32 %s1905_s28, 4  ;;  %s1909_s29 = int_to_ptr.hbm [resolvable:$true] %s1908_s29 }
 0x156   : > { %s1906_s17 = sshll.u32 %s392_s16, 4  ;;  %s2201_s22 = sshra.s32 %s1909_s29, 4  ;;  %s1907_s17 = int_to_ptr.vmem [resolvable:$true] %s1906_s17  ;;  %s2202_s22 = int_to_ptr.hbm [resolvable:$true] %s2201_s22 }
 0x157   : > { %v1307_v10 = vld.sshfl [vmem:[#allocation1 + $0x20] sm:$0xff pattern:$0x73625140]  ;;  %s2203_s24 = scalar_lea.hbm %s2202_s22, 32  ;;  %p2208_p4 = scmp.lt.s32.totalorder %s2202_s22, %s2920_s10 }
 0x158   : > { %v1362_v27 = vsel %vm2800_vm7, 0.0, %v1307_v10  ;;  %p2204_p0 = scmp.ne.s32.totalorder %s2202_s22, %s2203_s24  ;;  %p2209_p5 = scmp.lt.s32.totalorder %s2207_s25, %s2203_s24 }
 0x159   : > { %1391 = vst.msk [vmem:[#allocation2 + $0xc8] sm:$0xff] %vm1364_vm10, %v1362_v27 }
 0x15a   : > { %v1309_v11 = vld.sshfl [vmem:[#allocation1] sm:$0xff pattern:$0x73625140]  ;;  %p2205_p1 = pnand %p2204_p0, %p2391_p3  ;;  %p2210_p6 = por %p2209_p5, %p2208_p4 }
 0x15b   : > { %v1363_v12 = vsel %vm1194_vm8, 0.0, %v1309_v11 }
 0x15c   : > { %1392 = vst.msk [vmem:[#allocation2 + $0xd0] sm:$0x3] %vm1367_vm1, %v1363_v12  ;;  %p2206_p2 = pneg %p2205_p1 }
 0x15e   : > { %p2211_p7 = pnand %p2210_p6, %p2206_p2 }
 0x160   : > { %v1655_v32 = vld [vmem:[#allocation2 + $0xc0] ss:$2 sm:$0xff]  ;;  %v1699_v33 = vld [vmem:[#allocation2 + $0xc1] ss:$2 sm:$0xff] }
 0x161   : > { %2065 = vmatmul.msk.bf16.gmra.mxu1 %vm1364_vm10, %v1525_v17  ;;  %2068 = vmatmul.msk.bf16.gmra.mxu2 %vm1364_vm10, %v1569_v18  ;;  %v1657_v36 = vpack.c.bf16 %v1655_v32, %v1653_v34  ;;  %v1701_v37 = vpack.c.bf16 %v1699_v33, %v1697_v35 }
 0x163   : > { %v1743_v38 = vld [vmem:[#allocation2 + $0xc2] ss:$2 sm:$0xff] }
 0x164   : > { %v1745_v41 = vpack.c.bf16 %v1743_v38, %v1741_v39 }
 0x165   : > { %2071 = vmatmul.msk.bf16.gmra.mxu3 %vm1364_vm10, %v1613_v20 }
 0x171   : > { %2073 = vmatmul.msk.bf16.vlgmr.msra.gmra.mxu1 %vm1364_vm10, %v1656_v26  ;;  %2076 = vmatmul.msk.bf16.vlgmr.msra.gmra.mxu2 %vm1364_vm10, %v1700_v28  ;;  %v2184_v28 = vld [vmem:[%s2915_s5] ss:$0 sm:$0xff] }
 0x175   : > { %2079 = vmatmul.msk.bf16.vlgmr.msrb.gmra.mxu3 %vm1364_vm10, %v1744_v31 }
 0x17a   : > { %v1434_v42 = vpop.f32.mrf.mxu1 }
 0x180   : > { %v1462_v43 = vpop.f32.mrf.mxu2 }
 0x181   : > { %2074 = vmatmul.msk.bf16.gmra.mxu1 %vm1364_vm10, %v1657_v36  ;;  %2077 = vmatmul.msk.bf16.gmra.mxu2 %vm1364_vm10, %v1701_v37  ;;  %v1463_v3 = vadd.f32 %v1462_v43, %v1434_v42 }
 0x182   : > { %v1502_v44 = vpop.f32.mrf.mxu3  ;;  %v1436_v45 = vpop.f32.mrf.mxu1 }
 0x183   : > { %v1512_v6 = vadd.f32 %v1502_v44, %v1463_v3 }
 0x185   : > { %2080 = vmatmul.msk.bf16.gmra.mxu3 %vm1364_vm10, %v1745_v41 }
 0x188   : > { %v1464_v46 = vpop.f32.mrf.mxu2 }
 0x189   : > { %v1465_v5 = vadd.f32 %v1464_v46, %v1436_v45 }
 0x18a   : > { %v1504_v48 = vpop.f32.mrf.mxu3 }
 0x18b   : > { %v1513_v27 = vadd.f32 %v1504_v48, %v1465_v5 }
 0x191   : > { %2095 = vmatmul.msk.bf16.vlgmr.msrb.gmra.mxu2 %vm907_vm4, %v2105_v61 }
 0x1a1   : > { %2096 = vmatmul.msk.bf16.gmra.mxu2 %vm907_vm4, %v2106_v7  ;;  %vm1886_vm4 = vcmask 261120  }
 0x1be   : > { %v1439_v47 = vpop.f32.mrf.mxu1 }
 0x1c4   : > { %v1467_v50 = vpop.f32.mrf.mxu2 }
 0x1c5   : > { %v1468_v19 = vadd.f32 %v1467_v50, %v1439_v47 }
 0x1c6   : > { %v1441_v51 = vpop.f32.mrf.mxu1 }
 0x1c8   : > { %v1507_v52 = vpop.f32.mrf.mxu3 }
 0x1c9   : > { %v1514_v23 = vadd.f32 %v1507_v52, %v1468_v19 }
 0x1cc   : > { %v1469_v25 = vpop.f32.mrf.mxu2 }
 0x1cd   : > { %v1470_v24 = vadd.f32 %v1469_v25, %v1441_v51 }
 0x1ce   : > { %v1546_v55 = vpop.f32.mrf.mxu1 }
 0x1cf   : > { %v1556_v9 = vadd.f32 %v1546_v55, %v1512_v6 }
 0x1d0   : > { %v1509_v56 = vpop.f32.mrf.mxu3 }
 0x1d1   : > { %v1515_v33 = vadd.f32 %v1509_v56, %v1470_v24 }
 0x1d4   : > { %v1590_v57 = vpop.f32.mrf.mxu2 }
 0x1d5   : > { %v1600_v11 = vadd.f32 %v1590_v57, %v1556_v9 }
 0x1d6   : > { %v1548_v58 = vpop.f32.mrf.mxu1 }
 0x1d7   : > { %v1557_v12 = vadd.f32 %v1548_v58, %v1513_v27 }
 0x1d8   : > { %v1634_v59 = vpop.f32.mrf.mxu3 }
 0x1d9   : > { %v1644_v14 = vadd.f32 %v1634_v59, %v1600_v11 }
 0x1dc   : > { %v1592_v60 = vpop.f32.mrf.mxu2 }
 0x1dd   : > { %v1601_v15 = vadd.f32 %v1592_v60, %v1557_v12 }
 0x1de   : > { %v1551_v62 = vpop.f32.mrf.mxu1 }
 0x1df   : > { %v1558_v31 = vadd.f32 %v1551_v62, %v1514_v23  ;;  %v2185_v62 = vld [vmem:[%s2919_s9] ss:$0 sm:$0xff] }
 0x1e0   : > { %v1636_v63 = vpop.f32.mrf.mxu3 }
 0x1e1   : > { %v1645_v40 = vadd.f32 %v1636_v63, %v1601_v15  ;;  %v2186_v63 = vld [vmem:[%s2917_s7] ss:$0 sm:$0xff] }
 0x1e4   : > { %v1595_v0 = vpop.f32.mrf.mxu2 }
 0x1e5   : > { %v1602_v34 = vadd.f32 %v1595_v0, %v1558_v31 }
 0x1e6   : > { %v1553_v1 = vpop.f32.mrf.mxu1 }
 0x1e7   : > { %v1559_v37 = vadd.f32 %v1553_v1, %v1515_v33 }
 0x1e8   : > { %v1639_v2 = vpop.f32.mrf.mxu3 }
 0x1e9   : > { %v1646_v41 = vadd.f32 %v1639_v2, %v1602_v34 }
 0x1ec   : > { %v1597_v4 = vpop.f32.mrf.mxu2 }
 0x1ed   : > { %v1603_v42 = vadd.f32 %v1597_v4, %v1559_v37 }
 0x1ee   : > { %v1678_v8 = vpop.f32.mrf.mxu1 }
 0x1ef   : > { %v1688_v17 = vadd.f32 %v1678_v8, %v1644_v14 }
 0x1f0   : > { %v1641_v10 = vpop.f32.mrf.mxu3 }
 0x1f1   : > { %v1647_v49 = vadd.f32 %v1641_v10, %v1603_v42 }
 0x1f4   : > { %v1722_v13 = vpop.f32.mrf.mxu2 }
 0x1f5   : > { %v1732_v20 = vadd.f32 %v1722_v13, %v1688_v17 }
 0x1f6   : > { %v1680_v16 = vpop.f32.mrf.mxu1 }
 0x1f7   : > { %v1689_v21 = vadd.f32 %v1680_v16, %v1645_v40 }
 0x1f8   : > { %v1766_v18 = vpop.f32.mrf.mxu3 }
 0x1f9   : > { %v1776_v26 = vadd.f32 %v1766_v18, %v1732_v20 }
 0x1fb   : > { %v1784_v35 = vadd.f32 %v2184_v28, %v1776_v26 }
 0x1fc   : > { %v1724_v22 = vpop.f32.mrf.mxu2 }
 0x1fd   : > { %v1733_v29 = vadd.f32 %v1724_v22, %v1689_v21  ;;  %v1788_v43 = vmax.f32 %v1784_v35, 0.0 }
 0x1fe   : > { %v1683_v30 = vpop.f32.mrf.mxu1 }
 0x1ff   : > { %v1690_v46 = vadd.f32 %v1683_v30, %v1646_v41 }
 0x200   : > { %v1768_v32 = vpop.f32.mrf.mxu3 }
 0x201   : > { %v1777_v36 = vadd.f32 %v1768_v32, %v1733_v29 }
 0x203   : > { %v1785_v38 = vadd.f32 %v2184_v28, %v1777_v36 }
 0x204   : > { %v1727_v39 = vpop.f32.mrf.mxu2 }
 0x205   : > { %v1789_v44 = vmax.f32 %v1785_v38, 0.0  ;;  %v1734_v50 = vadd.f32 %v1727_v39, %v1690_v46 }
 0x206   : > { %v1685_v48 = vpop.f32.mrf.mxu1 }
 0x207   : > { %v1792_v45 = vpack.c.bf16 %v1789_v44, %v1788_v43  ;;  %v1691_v51 = vadd.f32 %v1685_v48, %v1647_v49 }
 0x208   : > { %v1771_v47 = vpop.f32.mrf.mxu3 }
 0x209   : > { %2081 = vmatmul.msk.bf16.vlgmr.msrb.gmra.mxu1 %vm1364_vm10, %v1792_v45  ;;  %v1778_v53 = vadd.f32 %v1771_v47, %v1734_v50 }
 0x20b   : > { %v1786_v55 = vadd.f32 %v2184_v28, %v1778_v53 }
 0x20c   : > { %v1729_v52 = vpop.f32.mrf.mxu2 }
 0x20d   : > { %v1735_v54 = vadd.f32 %v1729_v52, %v1691_v51  ;;  %v1790_v58 = vmax.f32 %v1786_v55, 0.0 }
 0x210   : > { %v1773_v25 = vpop.f32.mrf.mxu3 }
 0x211   : > { %v1779_v56 = vadd.f32 %v1773_v25, %v1735_v54 }
 0x213   : > { %v1787_v57 = vadd.f32 %v2184_v28, %v1779_v56 }
 0x214   : > { %v1868_v61 = vpop.f32.mrf.mxu2 }
 0x215   : > { %v1791_v59 = vmax.f32 %v1787_v57, 0.0  ;;  %v1869_v0 = vadd.f32 %v2185_v62, %v1868_v61 }
 0x217   : > { %v1793_v60 = vpack.c.bf16 %v1791_v59, %v1790_v58 }
 0x219   : > { %2082 = vmatmul.msk.bf16.gmra.mxu1 %vm1364_vm10, %v1793_v60 }
 0x21c   : > { %v1870_v3 = vpop.f32.mrf.mxu2 }
 0x21d   : > { %v1871_v7 = vadd.f32 %v2185_v62, %v1870_v3 }
 0x224   : > { %v1873_v10 = vpop.f32.mrf.mxu2 }
 0x225   : > { %v1874_v11 = vadd.f32 %v2185_v62, %v1873_v10 }
 0x22c   : > { %v1875_v16 = vpop.f32.mrf.mxu2 }
 0x22d   : > { %v1876_v18 = vadd.f32 %v2185_v62, %v1875_v16 }
 0x286   : > { %v1817_v1 = vpop.f32.mrf.mxu1 }
 0x287   : > { %v1818_v2 = vadd.f32 %v2186_v63, %v1817_v1 }
 0x289   : > { %v1878_v4 = vadd.f32 %v1869_v0, %v1818_v2 }
 0x28b   : > { %v1882_v6 = vmax.f32 %v1878_v4, 0.0 }
 0x28d   : > { %1887 = vst.msk [vmem:[%s392_s16] sm:$0xff] %vm1886_vm4, %v1882_v6 }
 0x28e   : > { %v1819_v5 = vpop.f32.mrf.mxu1 }
 0x28f   : > { %v1820_v8 = vadd.f32 %v2186_v63, %v1819_v5 }
 0x291   : > { %v1879_v9 = vadd.f32 %v1871_v7, %v1820_v8 }
 0x293   : > { %v1883_v27 = vmax.f32 %v1879_v9, 0.0 }
 0x295   : > { %1888 = vst.msk [vmem:[%s392_s16 + $0x8] sm:$0xff] %vm1886_vm4, %v1883_v27 }
 0x296   : > { %v1822_v12 = vpop.f32.mrf.mxu1 }
 0x297   : > { %v1823_v13 = vadd.f32 %v2186_v63, %v1822_v12 }
 0x299   : > { %v1880_v14 = vadd.f32 %v1874_v11, %v1823_v13 }
 0x29b   : > { %v1884_v15 = vmax.f32 %v1880_v14, 0.0 }
 0x29d   : > { %1889 = vst.msk [vmem:[%s392_s16 + $0x10] sm:$0xff] %vm1886_vm4, %v1884_v15 }
 0x29e   : > { %v1824_v17 = vpop.f32.mrf.mxu1 }
 0x29f   : > { %v1825_v19 = vadd.f32 %v2186_v63, %v1824_v17 }
 0x2a1   : > { %v1881_v40 = vadd.f32 %v1876_v18, %v1825_v19 }
 0x2a3   : > { %v1885_v20 = vmax.f32 %v1881_v40, 0.0 }
 0x2a5   : > { %1890 = vst.msk [vmem:[%s392_s16 + $0x18] sm:$0xff] %vm1886_vm4, %v1885_v20 }
 0x2a6   : > { %2214 = shalt.err (!%p2211_p7)
}
 0x2a7   : > { %s2283_s30 = smov 128   ;;  %s2284_s16 = smov 8  }
 0x2a8   : > { %2110 = dma.vmem_to_hbm [thread:$0]  (%p2391_p3), %s1907_s17, 512, %s1909_s29, %s1892_s12, %s2283_s30, %s2283_s30, %s2284_s16  }
 0x2a9 PF: > { %p2116_p9 = scmp.ge.s32.totalorder %s2281_s20, 2  ;;  %s1923_s23 = sand.u32 1, %s2253_s13  }
 0x2aa   : > { %s1924_s0 = scalar_lea.sflag [#allocation4], %s1923_s23 }
 0x2ab   : > { %p2113_p10 = pnand %p2116_p9, %p2400_p8 }
 0x2ad   : > { %p2114_p11 = pneg %p2113_p10 }
 0x2af   : > { %2248 = dma.done.wait (%p2114_p11), %s1924_s0, 512  }
 0x2b0   : > { %2250 = vsyncadd (%p2114_p11), %s1924_s0, 4294966784  ;;  %s23_s20 = sadd.s32 1, %s2281_s20   ;;  %s2957_s26 = sld [smem:[#allocation6_spill]] }
 0x2b1   : > { %p20_p12 = scmp.ge.s32.totalorder %s23_s20, 6   ;;  %s2958_s29 = sld [smem:[#allocation7_spill]] }
 0x2b2   : > { %s2959_s13 = smov %s2257_s14  ;;  %s2960_s14 = smov %s2261_s15 }
 0x2b3   : > { %s2961_s15 = smov %s2409_s11  ;;  %s2962_s16 = smov %s2273_s18 }
 0x2b4   : > { %s2963_s17 = smov %s2277_s19  ;;  %22 = sbr.rel (!%p20_p12) target bundleno = 7 (0x7), region = 156 }
 0x2b6   : > { %s2964_s18 = smov %s2957_s26 }
 0x2b7   : > { %s2965_s19 = smov %s2958_s29 }
 0x2b9   :  { %1930 = vsyncpa [#allocation4], 1 }
 0x2ba   :  { %1932 = vsyncpa [#allocation4 + $0x1], 1 }

</bundles_post_ra>
